<compile_context>
chip_gen: v7x
topology: tpu7x:2x2x1
jax: 0.10.0
libtpu: 0.0.40
codegen_flags: <defaults>
</compile_context>

<pallas_src>
import functools

import jax
import jax.numpy as jnp
from jax.experimental import pallas as pl
from jax.experimental.pallas import tpu as pltpu


# ---------------------------------------------------------------------------
# Fused kernel: one grid step = whole batch, all heads (head-batched einsums).
# ---------------------------------------------------------------------------
def _fused_attention_kernel(q_ref, k_ref, v_ref,
                            wq_ref, wk_ref, wv_ref, wo_ref, b_ref,
                            bias_ref, o_ref, *, batch, heads, scale):
    # q/k/v refs: (N*H, L, D) f32 head-batched activations; weights are bf16.
    q = q_ref[...].astype(jnp.bfloat16)
    k = k_ref[...].astype(jnp.bfloat16)
    v = v_ref[...].astype(jnp.bfloat16)

    # Shared per-head projections as head-batched MXU matmuls, f32 accumulate.
    qp = jnp.einsum("bld,bdf->blf", q, wq_ref[...],
                    preferred_element_type=jnp.float32)      # (N*H, Lq, D)
    kp = jnp.einsum("bld,bdf->blf", k, wk_ref[...],
                    preferred_element_type=jnp.float32)      # (N*H, Lk, D)
    vp = jnp.einsum("bld,bdf->blf", v, wv_ref[...],
                    preferred_element_type=jnp.float32)      # (N*H, Lv, D)

    # 1/sqrt(embed_size) applied in f32 (not folded into the bf16 weight).
    qp = qp * jnp.float32(scale)

    # Scores for all (batch, head) pairs in one batched MXU contraction.
    s = jnp.einsum("bqd,bkd->bqk",
                   qp.astype(jnp.bfloat16), kp.astype(jnp.bfloat16),
                   preferred_element_type=jnp.float32)       # (N*H, Lq, Lk) f32

    nh, lq, lk = s.shape

    # Additive mask bias (N, 1, Lk): broadcast over heads and Lq with one add.
    bias = bias_ref[...]                                     # (N, 1, Lk)
    s = (s.reshape(batch, heads, lq, lk)
         + bias[:, None, :, :]).reshape(nh, lq, lk)

    # Numerically stable softmax in f32 with deferred normalization.
    smax = jnp.max(s, axis=-1, keepdims=True)
    p = jnp.exp(s - smax)
    l = jnp.sum(p, axis=-1, keepdims=True)                   # (N*H, Lq, 1)

    o = jnp.einsum("bqk,bkd->bqd",
                   p.astype(jnp.bfloat16), vp.astype(jnp.bfloat16),
                   preferred_element_type=jnp.float32)       # (N*H, Lq, D)
    o = o * pl.reciprocal(l, approx=True)                    # EUP vrcp

    # fc_out: concat(heads) @ Wfc^T  ==  sum_h  o_h @ Wfc^T[h*D:(h+1)*D, :].
    out = jnp.einsum("bqd,bde->bqe", o.astype(jnp.bfloat16), wo_ref[...],
                     preferred_element_type=jnp.float32)     # (N*H, Lq, EP)
    out = out.reshape(batch, heads, lq, -1).sum(axis=1)      # (N, Lq, EP)

    o_ref[...] = out + b_ref[...]                            # bias (1, EP)


# ---------------------------------------------------------------------------
# Wrapper: weight / mask preprocessing (once, in XLA) + single pallas_call.
# ---------------------------------------------------------------------------
def self_attention_forward(values, keys, query, mask, params,
                           *, embed_size, heads):
    head_dim = embed_size // heads
    N, Lq, E = query.shape
    Lk = keys.shape[1]
    Lv = values.shape[1]
    NH = N * heads
    # Lane-dense output width (multiple of 128); extra lanes are zero-padded.
    EP = ((E + 127) // 128) * 128

    def split_heads(x, L):
        # (N, L, E) -> (N*H, L, D): head split + transpose done once by XLA.
        x = x.reshape(N, L, heads, head_dim)
        x = jnp.transpose(x, (0, 2, 1, 3))
        return x.reshape(NH, L, head_dim)

    qh = split_heads(query, Lq)
    kh = split_heads(keys, Lk)
    vh = split_heads(values, Lv)

    def bcast_w(w):
        # Shared nn.Linear(D, D) weight (out, in): x @ W^T, replicated per
        # (batch, head) so the kernel uses a single batched dot_general (bf16).
        return jnp.broadcast_to(w.T.astype(jnp.bfloat16)[None],
                                (NH, head_dim, head_dim))

    wq_b = bcast_w(params["wq"])
    wk_b = bcast_w(params["wk"])
    wv_b = bcast_w(params["wv"])

    # fc_out weight (E, H*D): transpose, zero-pad the output dim to EP lanes,
    # split per head, replicate per (batch, head).  bf16 for the MXU.
    wo_t = params["w_fc"].T                                          # (H*D, E)
    wo_pad = jnp.zeros((heads * head_dim, EP), jnp.float32).at[:, :E].set(wo_t)
    wo_b = jnp.broadcast_to(
        wo_pad.reshape(heads, head_dim, EP).astype(jnp.bfloat16)[None],
        (N, heads, head_dim, EP)).reshape(NH, head_dim, EP)

    b_pad = jnp.zeros((1, EP), jnp.float32).at[:, :E].set(
        params["b_fc"].reshape(1, E))

    # Compact additive mask bias (N, 1, Lk) — assumes the module's canonical
    # head/query-invariant key-padding mask of shape (N, 1, 1, Lk).
    # TODO(synk): a per-head / per-query (N, H, Lq, Lk) mask would need a
    # full-rank additive bias instead of this compact form.
    key_mask = mask.reshape(N, Lk)
    bias = jnp.where(key_mask == 0, jnp.float32(-1e20),
                     jnp.float32(0.0)).reshape(N, 1, Lk)

    kernel = functools.partial(_fused_attention_kernel,
                               batch=N, heads=heads,
                               scale=1.0 / (embed_size ** 0.5))

    out_p = pl.pallas_call(
        kernel,
        out_shape=jax.ShapeDtypeStruct((N, Lq, EP), jnp.float32),
        grid=(1,),
        in_specs=[
            pl.BlockSpec((NH, Lq, head_dim), lambda i: (0, 0, 0)),        # q
            pl.BlockSpec((NH, Lk, head_dim), lambda i: (0, 0, 0)),        # k
            pl.BlockSpec((NH, Lv, head_dim), lambda i: (0, 0, 0)),        # v
            pl.BlockSpec((NH, head_dim, head_dim), lambda i: (0, 0, 0)),  # Wq
            pl.BlockSpec((NH, head_dim, head_dim), lambda i: (0, 0, 0)),  # Wk
            pl.BlockSpec((NH, head_dim, head_dim), lambda i: (0, 0, 0)),  # Wv
            pl.BlockSpec((NH, head_dim, EP), lambda i: (0, 0, 0)),        # Wfc^T
            pl.BlockSpec((1, EP), lambda i: (0, 0)),                      # bias
            pl.BlockSpec((N, 1, Lk), lambda i: (0, 0, 0)),                # mask bias
        ],
        out_specs=pl.BlockSpec((N, Lq, EP), lambda i: (0, 0, 0)),
        compiler_params=pltpu.CompilerParams(
            dimension_semantics=("arbitrary",)),
    )(qh, kh, vh, wq_b, wk_b, wv_b, wo_b, b_pad, bias)

    return out_p[..., :E]


# ---------------------------------------------------------------------------
# Pure-JAX f32 reference mirroring the PyTorch module exactly.
# ---------------------------------------------------------------------------
def self_attention_reference(values, keys, query, mask, params,
                             *, embed_size, heads):
    head_dim = embed_size // heads
    N, Lq, _ = query.shape
    Lk, Lv = keys.shape[1], values.shape[1]
    v = values.reshape(N, Lv, heads, head_dim) @ params["wv"].T
    k = keys.reshape(N, Lk, heads, head_dim) @ params["wk"].T
    q = query.reshape(N, Lq, heads, head_dim) @ params["wq"].T
    energy = jnp.einsum("nqhd,nkhd->nhqk", q, k)
    energy = jnp.where(mask == 0, jnp.float32(-1e20), energy)
    attn = jax.nn.softmax(energy / jnp.sqrt(jnp.float32(embed_size)), axis=3)
    out = jnp.einsum("nhql,nlhd->nqhd", attn, v).reshape(N, Lq,
                                                         heads * head_dim)
    return out @ params["w_fc"].T + params["b_fc"].reshape(1, 1, -1)


if __name__ == "__main__":
    # Small shapes consistent with the module: batch=2, seq=8, embed=32, heads=4.
    N, L, E, H = 2, 8, 32, 4
    D = E // H

    key = jax.random.PRNGKey(0)
    kv, kk, kq, kwv, kwk, kwq, kwf, kbf, kmask = jax.random.split(key, 9)

    values = jax.random.normal(kv, (N, L, E), dtype=jnp.float32)
    keys_x = jax.random.normal(kk, (N, L, E), dtype=jnp.float32)
    query = jax.random.normal(kq, (N, L, E), dtype=jnp.float32)

    # Mask of shape (N, 1, 1, Lk): 1 = keep, 0 = masked out.
    mask = (jax.random.uniform(kmask, (N, 1, 1, L)) > 0.2).astype(jnp.float32)

    # Parameters follow nn.Linear layout: weight (out, in), bias (out,).
    params = {
        "wv": jax.random.normal(kwv, (D, D), dtype=jnp.float32) * 0.1,
        "wk": jax.random.normal(kwk, (D, D), dtype=jnp.float32) * 0.1,
        "wq": jax.random.normal(kwq, (D, D), dtype=jnp.float32) * 0.1,
        "w_fc": jax.random.normal(kwf, (E, H * D), dtype=jnp.float32) * 0.1,
        "b_fc": jax.random.normal(kbf, (E,), dtype=jnp.float32) * 0.1,
    }

    out = self_attention_forward(values, keys_x, query, mask, params,
                                 embed_size=E, heads=H)
    out = jax.block_until_ready(out)

    ref = self_attention_reference(values, keys_x, query, mask, params,
                                   embed_size=E, heads=H)
    assert out.shape == (N, L, E)
    # Tolerance loosened vs the original 1e-4 f32 check because the kernel now
    # runs all MXU contractions with bf16 operands (f32 accumulate), per the
    # performance review.
    assert jnp.allclose(out, ref, atol=3e-2, rtol=3e-2), "mismatch vs reference"

    print("KERNEL_OK")
</pallas_src>

<mosaic_0001>
module attributes {stable_mosaic.version = 11 : i64} {
  func.func @_fused_attention_kernel(%arg0: i32, %arg1: memref<8x8x8xf32, #tpu.memory_space<vmem>>, %arg2: memref<8x8x8xf32, #tpu.memory_space<vmem>>, %arg3: memref<8x8x8xf32, #tpu.memory_space<vmem>>, %arg4: memref<8x8x8xbf16, #tpu.memory_space<vmem>>, %arg5: memref<8x8x8xbf16, #tpu.memory_space<vmem>>, %arg6: memref<8x8x8xbf16, #tpu.memory_space<vmem>>, %arg7: memref<8x8x128xbf16, #tpu.memory_space<vmem>>, %arg8: memref<1x128xf32, #tpu.memory_space<vmem>>, %arg9: memref<2x1x8xf32, #tpu.memory_space<vmem>>, %arg10: memref<2x8x128xf32, #tpu.memory_space<vmem>>) attributes {dimension_semantics = [#tpu.dimension_semantics<arbitrary>], iteration_bounds = array<i64: 1>, scalar_prefetch = 0 : i64, scratch_operands = 0 : i64, tpu.core_type = #tpu.core_type<tc>, window_params = [{pipeline_mode = #tpu.pipeline_mode<synchronous>, transform_indices = @transform_0, window_bounds = array<i64: 8, 8, 8>}, {pipeline_mode = #tpu.pipeline_mode<synchronous>, transform_indices = @transform_1, window_bounds = array<i64: 8, 8, 8>}, {pipeline_mode = #tpu.pipeline_mode<synchronous>, transform_indices = @transform_2, window_bounds = array<i64: 8, 8, 8>}, {pipeline_mode = #tpu.pipeline_mode<synchronous>, transform_indices = @transform_3, window_bounds = array<i64: 8, 8, 8>}, {pipeline_mode = #tpu.pipeline_mode<synchronous>, transform_indices = @transform_4, window_bounds = array<i64: 8, 8, 8>}, {pipeline_mode = #tpu.pipeline_mode<synchronous>, transform_indices = @transform_5, window_bounds = array<i64: 8, 8, 8>}, {pipeline_mode = #tpu.pipeline_mode<synchronous>, transform_indices = @transform_6, window_bounds = array<i64: 8, 8, 128>}, {pipeline_mode = #tpu.pipeline_mode<synchronous>, transform_indices = @transform_7, window_bounds = array<i64: 1, 128>}, {pipeline_mode = #tpu.pipeline_mode<synchronous>, transform_indices = @transform_8, window_bounds = array<i64: 2, 1, 8>}, {pipeline_mode = #tpu.pipeline_mode<synchronous>, transform_indices = @transform_9, window_bounds = array<i64: 2, 8, 128>}]} {
    %c0 = arith.constant 0 : index
    %c0_0 = arith.constant 0 : index
    %c0_1 = arith.constant 0 : index
    %0 = vector.load %arg1[%c0, %c0_0, %c0_1] : memref<8x8x8xf32, #tpu.memory_space<vmem>>, vector<8x8x8xf32>
    %1 = arith.truncf %0 : vector<8x8x8xf32> to vector<8x8x8xbf16>
    %c0_2 = arith.constant 0 : index
    %c0_3 = arith.constant 0 : index
    %c0_4 = arith.constant 0 : index
    %2 = vector.load %arg2[%c0_2, %c0_3, %c0_4] : memref<8x8x8xf32, #tpu.memory_space<vmem>>, vector<8x8x8xf32>
    %3 = arith.truncf %2 : vector<8x8x8xf32> to vector<8x8x8xbf16>
    %c0_5 = arith.constant 0 : index
    %c0_6 = arith.constant 0 : index
    %c0_7 = arith.constant 0 : index
    %4 = vector.load %arg3[%c0_5, %c0_6, %c0_7] : memref<8x8x8xf32, #tpu.memory_space<vmem>>, vector<8x8x8xf32>
    %5 = arith.truncf %4 : vector<8x8x8xf32> to vector<8x8x8xbf16>
    %c0_8 = arith.constant 0 : index
    %c0_9 = arith.constant 0 : index
    %c0_10 = arith.constant 0 : index
    %6 = vector.load %arg4[%c0_8, %c0_9, %c0_10] : memref<8x8x8xbf16, #tpu.memory_space<vmem>>, vector<8x8x8xbf16>
    "tpu.trace_start"() <{level = 10 : i32, message = "bld,bdf->blf"}> : () -> ()
    %cst = arith.constant dense<0.000000e+00> : vector<8x8x8xf32>
    %7 = tpu.matmul %1, %6, %cst {dimension_numbers = #tpu.dot_dimension_numbers<[2], [1], [1], [2], [0, 0, 0, 1, 1, 2], [0], [0]>} : vector<8x8x8xbf16>, vector<8x8x8xbf16>, vector<8x8x8xf32> -> vector<8x8x8xf32>
    "tpu.trace_stop"() : () -> ()
    %c0_11 = arith.constant 0 : index
    %c0_12 = arith.constant 0 : index
    %c0_13 = arith.constant 0 : index
    %8 = vector.load %arg5[%c0_11, %c0_12, %c0_13] : memref<8x8x8xbf16, #tpu.memory_space<vmem>>, vector<8x8x8xbf16>
    "tpu.trace_start"() <{level = 10 : i32, message = "bld,bdf->blf"}> : () -> ()
    %cst_14 = arith.constant dense<0.000000e+00> : vector<8x8x8xf32>
    %9 = tpu.matmul %3, %8, %cst_14 {dimension_numbers = #tpu.dot_dimension_numbers<[2], [1], [1], [2], [0, 0, 0, 1, 1, 2], [0], [0]>} : vector<8x8x8xbf16>, vector<8x8x8xbf16>, vector<8x8x8xf32> -> vector<8x8x8xf32>
    "tpu.trace_stop"() : () -> ()
    %c0_15 = arith.constant 0 : index
    %c0_16 = arith.constant 0 : index
    %c0_17 = arith.constant 0 : index
    %10 = vector.load %arg6[%c0_15, %c0_16, %c0_17] : memref<8x8x8xbf16, #tpu.memory_space<vmem>>, vector<8x8x8xbf16>
    "tpu.trace_start"() <{level = 10 : i32, message = "bld,bdf->blf"}> : () -> ()
    %cst_18 = arith.constant dense<0.000000e+00> : vector<8x8x8xf32>
    %11 = tpu.matmul %5, %10, %cst_18 {dimension_numbers = #tpu.dot_dimension_numbers<[2], [1], [1], [2], [0, 0, 0, 1, 1, 2], [0], [0]>} : vector<8x8x8xbf16>, vector<8x8x8xbf16>, vector<8x8x8xf32> -> vector<8x8x8xf32>
    "tpu.trace_stop"() : () -> ()
    %cst_19 = arith.constant 0.176776692 : f32
    %12 = vector.broadcast %cst_19 : f32 to vector<8x8x8xf32>
    %13 = arith.mulf %7, %12 : vector<8x8x8xf32>
    %14 = arith.truncf %13 : vector<8x8x8xf32> to vector<8x8x8xbf16>
    %15 = arith.truncf %9 : vector<8x8x8xf32> to vector<8x8x8xbf16>
    "tpu.trace_start"() <{level = 10 : i32, message = "bqd,bkd->bqk"}> : () -> ()
    %cst_20 = arith.constant dense<0.000000e+00> : vector<8x8x8xf32>
    %16 = tpu.matmul %14, %15, %cst_20 {dimension_numbers = #tpu.dot_dimension_numbers<[2], [2], [1], [1], [0, 0, 0, 1, 1, 1], [0], [0]>} : vector<8x8x8xbf16>, vector<8x8x8xbf16>, vector<8x8x8xf32> -> vector<8x8x8xf32>
    "tpu.trace_stop"() : () -> ()
    %c0_21 = arith.constant 0 : index
    %c0_22 = arith.constant 0 : index
    %c0_23 = arith.constant 0 : index
    %17 = vector.load %arg9[%c0_21, %c0_22, %c0_23] : memref<2x1x8xf32, #tpu.memory_space<vmem>>, vector<2x1x8xf32>
    %18 = vector.shape_cast %16 : vector<8x8x8xf32> to vector<2x4x8x8xf32>
    %19 = vector.shape_cast %17 : vector<2x1x8xf32> to vector<2x1x1x8xf32>
    %20 = vector.broadcast %19 : vector<2x1x1x8xf32> to vector<2x4x8x8xf32>
    %21 = arith.addf %18, %20 : vector<2x4x8x8xf32>
    %22 = vector.shape_cast %21 : vector<2x4x8x8xf32> to vector<8x8x8xf32>
    %cst_24 = arith.constant dense<0xFF800000> : vector<8x8xf32>
    %23 = vector.multi_reduction <maximumf>, %22, %cst_24 [2] : vector<8x8x8xf32> to vector<8x8xf32>
    %24 = vector.shape_cast %23 : vector<8x8xf32> to vector<8x8x1xf32>
    %25 = vector.broadcast %24 : vector<8x8x1xf32> to vector<8x8x8xf32>
    %26 = arith.subf %22, %25 : vector<8x8x8xf32>
    %27 = math.exp %26 : vector<8x8x8xf32>
    %cst_25 = arith.constant dense<0.000000e+00> : vector<8x8xf32>
    %28 = vector.multi_reduction <add>, %27, %cst_25 [2] : vector<8x8x8xf32> to vector<8x8xf32>
    %29 = vector.shape_cast %28 : vector<8x8xf32> to vector<8x8x1xf32>
    %30 = arith.truncf %27 : vector<8x8x8xf32> to vector<8x8x8xbf16>
    %31 = arith.truncf %11 : vector<8x8x8xf32> to vector<8x8x8xbf16>
    "tpu.trace_start"() <{level = 10 : i32, message = "bqk,bkd->bqd"}> : () -> ()
    %cst_26 = arith.constant dense<0.000000e+00> : vector<8x8x8xf32>
    %32 = tpu.matmul %30, %31, %cst_26 {dimension_numbers = #tpu.dot_dimension_numbers<[2], [1], [1], [2], [0, 0, 0, 1, 1, 2], [0], [0]>} : vector<8x8x8xbf16>, vector<8x8x8xbf16>, vector<8x8x8xf32> -> vector<8x8x8xf32>
    "tpu.trace_stop"() : () -> ()
    %33 = tpu.reciprocal %29 {approx = true} : vector<8x8x1xf32> -> vector<8x8x1xf32>
    %34 = vector.broadcast %33 : vector<8x8x1xf32> to vector<8x8x8xf32>
    %35 = arith.mulf %32, %34 : vector<8x8x8xf32>
    %36 = arith.truncf %35 : vector<8x8x8xf32> to vector<8x8x8xbf16>
    %c0_27 = arith.constant 0 : index
    %c0_28 = arith.constant 0 : index
    %c0_29 = arith.constant 0 : index
    %37 = vector.load %arg7[%c0_27, %c0_28, %c0_29] : memref<8x8x128xbf16, #tpu.memory_space<vmem>>, vector<8x8x128xbf16>
    "tpu.trace_start"() <{level = 10 : i32, message = "bqd,bde->bqe"}> : () -> ()
    %cst_30 = arith.constant dense<0.000000e+00> : vector<8x8x128xf32>
    %38 = tpu.matmul %36, %37, %cst_30 {dimension_numbers = #tpu.dot_dimension_numbers<[2], [1], [1], [2], [0, 0, 0, 1, 1, 2], [0], [0]>} : vector<8x8x8xbf16>, vector<8x8x128xbf16>, vector<8x8x128xf32> -> vector<8x8x128xf32>
    "tpu.trace_stop"() : () -> ()
    %39 = vector.shape_cast %38 : vector<8x8x128xf32> to vector<2x4x8x128xf32>
    %cst_31 = arith.constant dense<0.000000e+00> : vector<2x8x128xf32>
    %40 = vector.multi_reduction <add>, %39, %cst_31 [1] : vector<2x4x8x128xf32> to vector<2x8x128xf32>
    %c0_32 = arith.constant 0 : index
    %c0_33 = arith.constant 0 : index
    %41 = vector.load %arg8[%c0_32, %c0_33] : memref<1x128xf32, #tpu.memory_space<vmem>>, vector<1x128xf32>
    %42 = vector.shape_cast %41 : vector<1x128xf32> to vector<1x1x128xf32>
    %43 = vector.broadcast %42 : vector<1x1x128xf32> to vector<2x8x128xf32>
    %44 = arith.addf %40, %43 : vector<2x8x128xf32>
    %c0_34 = arith.constant 0 : index
    %c0_35 = arith.constant 0 : index
    %c0_36 = arith.constant 0 : index
    %45 = vector.load %arg10[%c0_34, %c0_35, %c0_36] : memref<2x8x128xf32, #tpu.memory_space<vmem>>, vector<2x8x128xf32>
    tpu.vector_store %arg10[%c0_34, %c0_35, %c0_36], %44 {strides = array<i32>} : memref<2x8x128xf32, #tpu.memory_space<vmem>>, vector<2x8x128xf32>,
    return
  }
  func.func @transform_0(%arg0: i32) -> (i32, i32, i32) {
    %c0_i32 = arith.constant 0 : i32
    %c0_i32_0 = arith.constant 0 : i32
    %c0_i32_1 = arith.constant 0 : i32
    %c0_i32_2 = arith.constant 0 : i32
    return %c0_i32, %c0_i32_0, %c0_i32_1 : i32, i32, i32
  }
  func.func @transform_1(%arg0: i32) -> (i32, i32, i32) {
    %c0_i32 = arith.constant 0 : i32
    %c0_i32_0 = arith.constant 0 : i32
    %c0_i32_1 = arith.constant 0 : i32
    %c0_i32_2 = arith.constant 0 : i32
    return %c0_i32, %c0_i32_0, %c0_i32_1 : i32, i32, i32
  }
  func.func @transform_2(%arg0: i32) -> (i32, i32, i32) {
    %c0_i32 = arith.constant 0 : i32
    %c0_i32_0 = arith.constant 0 : i32
    %c0_i32_1 = arith.constant 0 : i32
    %c0_i32_2 = arith.constant 0 : i32
    return %c0_i32, %c0_i32_0, %c0_i32_1 : i32, i32, i32
  }
  func.func @transform_3(%arg0: i32) -> (i32, i32, i32) {
    %c0_i32 = arith.constant 0 : i32
    %c0_i32_0 = arith.constant 0 : i32
    %c0_i32_1 = arith.constant 0 : i32
    %c0_i32_2 = arith.constant 0 : i32
    return %c0_i32, %c0_i32_0, %c0_i32_1 : i32, i32, i32
  }
  func.func @transform_4(%arg0: i32) -> (i32, i32, i32) {
    %c0_i32 = arith.constant 0 : i32
    %c0_i32_0 = arith.constant 0 : i32
    %c0_i32_1 = arith.constant 0 : i32
    %c0_i32_2 = arith.constant 0 : i32
    return %c0_i32, %c0_i32_0, %c0_i32_1 : i32, i32, i32
  }
  func.func @transform_5(%arg0: i32) -> (i32, i32, i32) {
    %c0_i32 = arith.constant 0 : i32
    %c0_i32_0 = arith.constant 0 : i32
    %c0_i32_1 = arith.constant 0 : i32
    %c0_i32_2 = arith.constant 0 : i32
    return %c0_i32, %c0_i32_0, %c0_i32_1 : i32, i32, i32
  }
  func.func @transform_6(%arg0: i32) -> (i32, i32, i32) {
    %c0_i32 = arith.constant 0 : i32
    %c0_i32_0 = arith.constant 0 : i32
    %c0_i32_1 = arith.constant 0 : i32
    %c0_i32_2 = arith.constant 0 : i32
    return %c0_i32, %c0_i32_0, %c0_i32_1 : i32, i32, i32
  }
  func.func @transform_7(%arg0: i32) -> (i32, i32) {
    %c0_i32 = arith.constant 0 : i32
    %c0_i32_0 = arith.constant 0 : i32
    %c0_i32_1 = arith.constant 0 : i32
    return %c0_i32, %c0_i32_0 : i32, i32
  }
  func.func @transform_8(%arg0: i32) -> (i32, i32, i32) {
    %c0_i32 = arith.constant 0 : i32
    %c0_i32_0 = arith.constant 0 : i32
    %c0_i32_1 = arith.constant 0 : i32
    %c0_i32_2 = arith.constant 0 : i32
    return %c0_i32, %c0_i32_0, %c0_i32_1 : i32, i32, i32
  }
  func.func @transform_9(%arg0: i32) -> (i32, i32, i32) {
    %c0_i32 = arith.constant 0 : i32
    %c0_i32_0 = arith.constant 0 : i32
    %c0_i32_1 = arith.constant 0 : i32
    %c0_i32_2 = arith.constant 0 : i32
    return %c0_i32, %c0_i32_0, %c0_i32_1 : i32, i32, i32
  }
}

</mosaic_0001>

<bundles_post_ra>
// kernel: tpu_custom_call.1
= control target key start
LH: loop header
LB: loop body
LE: loop exit
PB: predicated region body
PF: predicated region fallthrough
CT: control target
= control target key end

     0   :  { %14 = vsyncpa [#allocation3], 0  ;;  %s3795_s0 = inlined_call_operand.hbm [shape: f32[8,8,8], index: 0, kind: input, shape index: {}]   ;;  %s3796_s1 = inlined_call_operand.hbm [shape: f32[8,8,8], index: 1, kind: input, shape index: {}]   ;;  %s3797_s2 = inlined_call_operand.hbm [shape: f32[8,8,8], index: 2, kind: input, shape index: {}]   ;;  %s3798_s3 = inlined_call_operand.hbm [shape: bf16[8,8,8], index: 3, kind: input, shape index: {}]   ;;  %s3799_s4 = inlined_call_operand.hbm [shape: bf16[8,8,8], index: 4, kind: input, shape index: {}]   ;;  %s3800_s5 = inlined_call_operand.hbm [shape: bf16[8,8,8], index: 5, kind: input, shape index: {}]   ;;  %s3801_s6 = inlined_call_operand.hbm [shape: bf16[8,8,128], index: 6, kind: input, shape index: {}]   ;;  %s3802_s7 = inlined_call_operand.vmem [shape: f32[1,128], index: 7, kind: input, shape index: {}]   ;;  %s3803_s8 = inlined_call_operand.vmem [shape: f32[2,1,8], index: 8, kind: input, shape index: {}]   ;;  %s3804_s9 = inlined_call_operand.hbm [shape: f32[2,8,128], index: 9, kind: output, shape index: {}]  }
   0x1   :  { %15 = vsyncpa [#allocation6], 0 }
   0x2   :  { %16 = vsyncpa [#allocation9], 0 }
   0x3   :  { %17 = vsyncpa [#allocation12], 0 }
   0x4   :  { %18 = vsyncpa [#allocation4], 0  ;;  %s3281_s30 = smov [#allocation5]   ;;  %s3282_s11 = smov [#allocation8]  }
   0x5   :  { %s36_s10 = sshll.u32 %s3281_s30, 4  ;;  %s60_s12 = sshll.u32 %s3282_s11, 4  ;;  %s37_s10 = int_to_ptr.vmem [resolvable:$true] %s36_s10  ;;  %s3345_s12 = int_to_ptr.vmem [resolvable:$true] %s60_s12 }
   0x6   :  { %s3095_s15 = scalar_lea.hbm %s3796_s1, 1024 }
   0x7   :  { %p3096_p0 = scmp.ne.s32.totalorder %s3796_s1, %s3095_s15  ;;  %p3099_p1 = scmp.lt.u32.totalorder %s3095_s15, %s3796_s1 }
   0x9   :  { %p3101_p2 = pnand %p3099_p1, %p3096_p0 }
   0xb   :  { %3104 = shalt.err (!%p3101_p2)
}
   0xc   :  { %s3105_s20 = scalar_lea.vmem %s37_s10, 1024  ;;  %p3110_p4 = scmp.lt.s32.totalorder %s37_s10, %s37_s10 }
   0xd   :  { %p3106_p3 = scmp.ne.s32.totalorder %s37_s10, %s3105_s20  ;;  %p3111_p5 = scmp.lt.s32.totalorder %s3105_s20, %s3105_s20 }
   0xf   :  { %p3112_p6 = por %p3111_p5, %p3110_p4 }
  0x11   :  { %p3113_p7 = pnand %p3112_p6, %p3106_p3 }
  0x13   :  { %3116 = shalt.err (!%p3113_p7)
}
  0x14   :  { %s3283_s21 = smov 128   ;;  %s3284_s22 = smov 8  }
  0x15   :  { %42 = dma.hbm_to_vmem [thread:$0]  %s3796_s1, 1024, %s37_s10, [#allocation6], %s3283_s21, %s3283_s21, %s3284_s22  }
  0x16   :  { %s3117_s27 = scalar_lea.hbm %s3798_s3, 512 }
  0x17   :  { %p3118_p8 = scmp.ne.s32.totalorder %s3798_s3, %s3117_s27  ;;  %p3121_p9 = scmp.lt.u32.totalorder %s3117_s27, %s3798_s3 }
  0x19   :  { %p3123_p10 = pnand %p3121_p9, %p3118_p8 }
  0x1b   :  { %3126 = shalt.err (!%p3123_p10)
}
  0x1c   :  { %s3127_s13 = scalar_lea.vmem %s3345_s12, 512  ;;  %p3132_p12 = scmp.lt.s32.totalorder %s3345_s12, %s3345_s12 }
  0x1d   :  { %p3128_p11 = scmp.ne.s32.totalorder %s3345_s12, %s3127_s13  ;;  %p3133_p13 = scmp.lt.s32.totalorder %s3127_s13, %s3127_s13 }
  0x1f   :  { %p3134_p0 = por %p3133_p13, %p3132_p12 }
  0x21   :  { %p3135_p1 = pnand %p3134_p0, %p3128_p11 }
  0x23   :  { %3138 = shalt.err (!%p3135_p1)
}
  0x24   :  { %s3285_s1 = smov 64   ;;  %s3286_s10 = smov 4  }
  0x25   :  { %66 = dma.hbm_to_vmem [thread:$0]  %s3798_s3, 512, %s3345_s12, [#allocation9], %s3285_s1, %s3285_s1, %s3286_s10  }
  0x26   :  { %s3287_s16 = smov [#allocation11]   ;;  %s3288_s18 = smov [#allocation2]  }
  0x27   :  { %s84_s17 = sshll.u32 %s3287_s16, 4  ;;  %s24_s19 = sshll.u32 %s3288_s18, 4  ;;  %s85_s17 = int_to_ptr.vmem [resolvable:$true] %s84_s17  ;;  %s3382_s19 = int_to_ptr.vmem [resolvable:$true] %s24_s19 }
  0x28   :  { %s3139_s24 = scalar_lea.hbm %s3800_s5, 512 }
  0x29   :  { %p3140_p2 = scmp.ne.s32.totalorder %s3800_s5, %s3139_s24  ;;  %p3143_p3 = scmp.lt.u32.totalorder %s3139_s24, %s3800_s5 }
  0x2b   :  { %p3145_p4 = pnand %p3143_p3, %p3140_p2 }
  0x2d   :  { %3148 = shalt.err (!%p3145_p4)
}
  0x2e   :  { %s3149_s3 = scalar_lea.vmem %s85_s17, 512  ;;  %p3154_p6 = scmp.lt.s32.totalorder %s85_s17, %s85_s17 }
  0x2f   :  { %p3150_p5 = scmp.ne.s32.totalorder %s85_s17, %s3149_s3  ;;  %p3155_p7 = scmp.lt.s32.totalorder %s3149_s3, %s3149_s3 }
  0x31   :  { %p3156_p8 = por %p3155_p7, %p3154_p6 }
  0x33   :  { %p3157_p9 = pnand %p3156_p8, %p3150_p5 }
  0x35   :  { %3160 = shalt.err (!%p3157_p9)
}
  0x36   :  { %90 = dma.hbm_to_vmem [thread:$0]  %s3800_s5, 512, %s85_s17, [#allocation12], %s3285_s1, %s3285_s1, %s3286_s10  }
  0x37   :  { %s3161_s13 = scalar_lea.hbm %s3795_s0, 1024 }
  0x38   :  { %p3162_p10 = scmp.ne.s32.totalorder %s3795_s0, %s3161_s13  ;;  %p3165_p11 = scmp.lt.u32.totalorder %s3161_s13, %s3795_s0 }
  0x3a   :  { %p3167_p12 = pnand %p3165_p11, %p3162_p10 }
  0x3c   :  { %3170 = shalt.err (!%p3167_p12)
}
  0x3d   :  { %s3171_s20 = scalar_lea.vmem %s3382_s19, 1024  ;;  %p3176_p0 = scmp.lt.s32.totalorder %s3382_s19, %s3382_s19 }
  0x3e   :  { %p3172_p13 = scmp.ne.s32.totalorder %s3382_s19, %s3171_s20  ;;  %p3177_p1 = scmp.lt.s32.totalorder %s3171_s20, %s3171_s20 }
  0x40   :  { %p3178_p2 = por %p3177_p1, %p3176_p0 }
  0x42   :  { %p3179_p3 = pnand %p3178_p2, %p3172_p13 }
  0x44   :  { %3182 = shalt.err (!%p3179_p3)
}
  0x45   :  { %30 = dma.hbm_to_vmem [thread:$0]  %s3795_s0, 1024, %s3382_s19, [#allocation3], %s3283_s21, %s3283_s21, %s3284_s22  }
  0x46   :  { %s3289_s23 = smov [#allocation7]   ;;  %s3290_s25 = smov [#allocation10]  }
  0x47   :  { %s48_s24 = sshll.u32 %s3289_s23, 4  ;;  %s72_s26 = sshll.u32 %s3290_s25, 4  ;;  %s49_s24 = int_to_ptr.vmem [resolvable:$true] %s48_s24  ;;  %s3419_s26 = int_to_ptr.vmem [resolvable:$true] %s72_s26 }
  0x48   :  { %s3183_s3 = scalar_lea.hbm %s3797_s2, 1024 }
  0x49   :  { %p3184_p4 = scmp.ne.s32.totalorder %s3797_s2, %s3183_s3  ;;  %p3187_p5 = scmp.lt.u32.totalorder %s3183_s3, %s3797_s2 }
  0x4b   :  { %p3189_p6 = pnand %p3187_p5, %p3184_p4 }
  0x4d   :  { %3192 = shalt.err (!%p3189_p6)
}
  0x4e   :  { %s3193_s0 = scalar_lea.vmem %s49_s24, 1024  ;;  %p3198_p8 = scmp.lt.s32.totalorder %s49_s24, %s49_s24 }
  0x4f   :  { %p3194_p7 = scmp.ne.s32.totalorder %s49_s24, %s3193_s0  ;;  %p3199_p9 = scmp.lt.s32.totalorder %s3193_s0, %s3193_s0 }
  0x51   :  { %p3200_p10 = por %p3199_p9, %p3198_p8 }
  0x53   :  { %p3201_p11 = pnand %p3200_p10, %p3194_p7 }
  0x55   :  { %3204 = shalt.err (!%p3201_p11)
}
  0x56   :  { %54 = dma.hbm_to_vmem [thread:$0]  %s3797_s2, 1024, %s49_s24, [#allocation6], %s3283_s21, %s3283_s21, %s3284_s22  }
  0x57   :  { %s3205_s16 = scalar_lea.hbm %s3799_s4, 512 }
  0x58   :  { %p3206_p12 = scmp.ne.s32.totalorder %s3799_s4, %s3205_s16  ;;  %p3209_p13 = scmp.lt.u32.totalorder %s3205_s16, %s3799_s4 }
  0x5a   :  { %p3211_p0 = pnand %p3209_p13, %p3206_p12 }
  0x5c   :  { %3214 = shalt.err (!%p3211_p0)
}
  0x5d   :  { %s3215_s23 = scalar_lea.vmem %s3419_s26, 512  ;;  %p3220_p2 = scmp.lt.s32.totalorder %s3419_s26, %s3419_s26 }
  0x5e   :  { %p3216_p1 = scmp.ne.s32.totalorder %s3419_s26, %s3215_s23  ;;  %p3221_p3 = scmp.lt.s32.totalorder %s3215_s23, %s3215_s23 }
  0x60   :  { %p3222_p4 = por %p3221_p3, %p3220_p2 }
  0x62   :  { %p3223_p5 = pnand %p3222_p4, %p3216_p1 }
  0x64   :  { %3226 = shalt.err (!%p3223_p5)
}
  0x65   :  { %78 = dma.hbm_to_vmem [thread:$0]  %s3799_s4, 512, %s3419_s26, [#allocation9], %s3285_s1, %s3285_s1, %s3286_s10  }
  0x66   :  { %s3291_s25 = smov [#allocation13]   ;;  %s3227_s12 = scalar_lea.hbm %s3801_s6, 512 }
  0x67   :  { %s96_s27 = sshll.u32 %s3291_s25, 4  ;;  %p3228_p6 = scmp.ne.s32.totalorder %s3801_s6, %s3227_s12  ;;  %s97_s27 = int_to_ptr.vmem [resolvable:$true] %s96_s27 }
  0x68   :  { %p3231_p7 = scmp.lt.u32.totalorder %s3227_s12, %s3801_s6 }
  0x6a   :  { %p3233_p8 = pnand %p3231_p7, %p3228_p6 }
  0x6c   :  { %3236 = shalt.err (!%p3233_p8)
}
  0x6d   :  { %s3237_s19 = scalar_lea.vmem %s97_s27, 512  ;;  %p3242_p10 = scmp.lt.s32.totalorder %s97_s27, %s97_s27 }
  0x6e   :  { %p3238_p9 = scmp.ne.s32.totalorder %s97_s27, %s3237_s19  ;;  %p3243_p11 = scmp.lt.s32.totalorder %s3237_s19, %s3237_s19 }
  0x70   :  { %p3244_p12 = por %p3243_p11, %p3242_p10 }
  0x72   :  { %p3245_p13 = pnand %p3244_p12, %p3238_p9 }
  0x74   :  { %3248 = shalt.err (!%p3245_p13)
}
  0x75   :  { %102 = dma.hbm_to_vmem [thread:$0]  %s3801_s6, 512, %s97_s27, [#allocation12], %s3285_s1, %s3285_s1, %s3286_s10  }
  0x76   :  { %3271 = dma.done.wait [#allocation3], 1024  }
  0x77   :  { %3272 = vsyncadd [#allocation3], 4294966272 }
  0x78   :  { %3273 = dma.done.wait [#allocation6], 2048  }
  0x79   :  { %3274 = vsyncadd [#allocation6], 4294965248 }
  0x7a   :  { %3275 = dma.done.wait [#allocation9], 1024  }
  0x7b   :  { %3276 = vsyncadd [#allocation9], 4294966272 }
  0x7c   :  { %3277 = dma.done.wait [#allocation12], 1024  }
  0x7d   :  { %3278 = vsyncadd [#allocation12], 4294966272  ;;  %v3292_v0 = vmov 0.0   ;;  %vm3293_vm0 = vmmov 0   ;;  %vm189_vm1 = vcmask 1043456   ;;  %v129_v3 = vld [vmem:[#allocation2] sm:$0xff] }
  0x7e   :  { %2761 = vmatprep.subr.bf16.mxu0 %v3292_v0  ;;  %2767 = vmatprep.subr.bf16.mxu1 %v3292_v0  ;;  %v177_v1 = vld [vmem:[#allocation8] sm:$0xf]  ;;  %v178_v2 = vld [vmem:[#allocation8 + $0x4] sm:$0xf]  ;;  %v137_v6 = vpack.c.bf16 %v129_v3, %v129_v3  ;;  %v130_v7 = vld [vmem:[#allocation2 + $0x8] sm:$0xff]  ;;  %vm185_vm2 = vcmask 64512  }
  0x7f   :  { %2763 = vmatprep.mubr.msk.bf16.mxu0 %vm3293_vm0, %v3292_v0  ;;  %2769 = vmatprep.mubr.msk.bf16.mxu1 %vm3293_vm0, %v3292_v0  ;;  %v191_v4 = vsel %vm189_vm1, %v177_v1, 0  ;;  %v237_v5 = vsel %vm189_vm1, %v178_v2, 0  ;;  %v179_v8 = vld [vmem:[#allocation8 + $0x8] sm:$0xf]  ;;  %v138_v9 = vpack.c.bf16 %v130_v7, %v130_v7  ;;  %v180_v10 = vld [vmem:[#allocation8 + $0xc] sm:$0xf] }
  0x80   :  { %2762 = vmatpush3.bf16.msra.mxu0 %v191_v4  ;;  %2768 = vmatpush3.bf16.msra.mxu1 %v237_v5  ;;  %v283_v11 = vsel %vm189_vm1, %v179_v8, 0  ;;  %v329_v12 = vsel %vm189_vm1, %v180_v10, 0  ;;  %v131_v13 = vld [vmem:[#allocation2 + $0x10] sm:$0xff]  ;;  %v132_v14 = vld [vmem:[#allocation2 + $0x18] sm:$0xff]  ;;  %v133_v21 = vld [vmem:[#allocation2 + $0x20] sm:$0xff] }
  0x81   :  { %2773 = vmatprep.subr.bf16.mxu0 %v3292_v0  ;;  %2779 = vmatprep.subr.bf16.mxu1 %v3292_v0  ;;  %v181_v15 = vld [vmem:[#allocation8 + $0x10] sm:$0xf]  ;;  %v182_v16 = vld [vmem:[#allocation8 + $0x14] sm:$0xf]  ;;  %v139_v17 = vpack.c.bf16 %v131_v13, %v131_v13  ;;  %v140_v18 = vpack.c.bf16 %v132_v14, %v132_v14  ;;  %v134_v22 = vld [vmem:[#allocation2 + $0x28] sm:$0xff]  ;;  %v141_v25 = vpack.c.bf16 %v133_v21, %v133_v21 }
  0x82   :  { %v375_v19 = vsel %vm189_vm1, %v181_v15, 0  ;;  %v421_v20 = vsel %vm189_vm1, %v182_v16, 0  ;;  %v183_v23 = vld [vmem:[#allocation8 + $0x18] sm:$0xf]  ;;  %v184_v24 = vld [vmem:[#allocation8 + $0x1c] sm:$0xf]  ;;  %v142_v26 = vpack.c.bf16 %v134_v22, %v134_v22 }
  0x83   :  { %2764 = vmatmul.mubr.msk.bf16.vlgmr.msra.gmra.mrb[0].mxu0 %vm185_vm2, %v137_v6  ;;  %2770 = vmatmul.mubr.msk.bf16.vlgmr.msra.gmra.mrb[0].mxu1 %vm185_vm2, %v138_v9  ;;  %v467_v27 = vsel %vm189_vm1, %v183_v23, 0  ;;  %v513_v28 = vsel %vm189_vm1, %v184_v24, 0  ;;  %v135_v29 = vld [vmem:[#allocation2 + $0x30] sm:$0xff]  ;;  %v136_v30 = vld [vmem:[#allocation2 + $0x38] sm:$0xff]  ;;  %v555_v31 = vld [vmem:[#allocation10] sm:$0xf] }
  0x84   :  { %2774 = vmatpush3.bf16.msra.mxu0 %v283_v11  ;;  %2780 = vmatpush3.bf16.msra.mxu1 %v329_v12  ;;  %v556_v32 = vld [vmem:[#allocation10 + $0x4] sm:$0xf]  ;;  %v143_v33 = vpack.c.bf16 %v135_v29, %v135_v29  ;;  %v144_v34 = vpack.c.bf16 %v136_v30, %v136_v30  ;;  %v567_v35 = vsel %vm189_vm1, %v555_v31, 0  ;;  %v146_v38 = vld [vmem:[#allocation5 + $0x8] sm:$0xff]  ;;  %v147_v45 = vld [vmem:[#allocation5 + $0x10] sm:$0xff] }
  0x85   :  { %2775 = vmatprep.mubr.msk.bf16.mxu0 %vm3293_vm0, %v3292_v0  ;;  %2781 = vmatprep.mubr.msk.bf16.mxu1 %vm3293_vm0, %v3292_v0  ;;  %v613_v36 = vsel %vm189_vm1, %v556_v32, 0  ;;  %v145_v37 = vld [vmem:[#allocation5] sm:$0xff]  ;;  %v557_v39 = vld [vmem:[#allocation10 + $0x8] sm:$0xf]  ;;  %v558_v40 = vld [vmem:[#allocation10 + $0xc] sm:$0xf]  ;;  %v154_v42 = vpack.c.bf16 %v146_v38, %v146_v38  ;;  %v155_v49 = vpack.c.bf16 %v147_v45, %v147_v45 }
  0x86   :  { %2785 = vmatprep.subr.bf16.mxu0 %v3292_v0  ;;  %2791 = vmatprep.subr.bf16.mxu1 %v3292_v0  ;;  %v153_v41 = vpack.c.bf16 %v145_v37, %v145_v37  ;;  %v659_v43 = vsel %vm189_vm1, %v557_v39, 0  ;;  %v705_v44 = vsel %vm189_vm1, %v558_v40, 0  ;;  %v148_v46 = vld [vmem:[#allocation5 + $0x18] sm:$0xff]  ;;  %v559_v47 = vld [vmem:[#allocation10 + $0x10] sm:$0xf]  ;;  %v149_v53 = vld [vmem:[#allocation5 + $0x20] sm:$0xff] }
  0x87   :  { %v560_v48 = vld [vmem:[#allocation10 + $0x14] sm:$0xf]  ;;  %v156_v50 = vpack.c.bf16 %v148_v46, %v148_v46  ;;  %v751_v51 = vsel %vm189_vm1, %v559_v47, 0  ;;  %v150_v54 = vld [vmem:[#allocation5 + $0x28] sm:$0xff]  ;;  %v561_v55 = vld [vmem:[#allocation10 + $0x18] sm:$0xf]  ;;  %v157_v57 = vpack.c.bf16 %v149_v53, %v149_v53 }
  0x88   :  { %v797_v52 = vsel %vm189_vm1, %v560_v48, 0  ;;  %v562_v56 = vld [vmem:[#allocation10 + $0x1c] sm:$0xf]  ;;  %v158_v58 = vpack.c.bf16 %v150_v54, %v150_v54  ;;  %v843_v59 = vsel %vm189_vm1, %v561_v55, 0  ;;  %v151_v61 = vld [vmem:[#allocation5 + $0x30] sm:$0xff]  ;;  %v161_v4 = vld [vmem:[#allocation7] sm:$0xff] }
  0x89   :  { %v889_v60 = vsel %vm189_vm1, %v562_v56, 0  ;;  %v152_v62 = vld [vmem:[#allocation5 + $0x38] sm:$0xff]  ;;  %v159_v63 = vpack.c.bf16 %v151_v61, %v151_v61  ;;  %v931_v2 = vld [vmem:[#allocation11] sm:$0xf]  ;;  %v169_v5 = vpack.c.bf16 %v161_v4, %v161_v4  ;;  %v932_v6 = vld [vmem:[#allocation11 + $0x4] sm:$0xf] }
  0x8a   :  { %v160_v1 = vpack.c.bf16 %v152_v62, %v152_v62  ;;  %v943_v3 = vsel %vm189_vm1, %v931_v2, 0  ;;  %v989_v7 = vsel %vm189_vm1, %v932_v6, 0  ;;  %v162_v8 = vld [vmem:[#allocation7 + $0x8] sm:$0xff]  ;;  %v163_v12 = vld [vmem:[#allocation7 + $0x10] sm:$0xff]  ;;  %v164_v16 = vld [vmem:[#allocation7 + $0x18] sm:$0xff] }
  0x8b   :  { %2776 = vmatmul.mubr.msk.bf16.vlgmr.msra.gmra.mrb[4].mxu0 %vm185_vm2, %v139_v17  ;;  %2782 = vmatmul.mubr.msk.bf16.vlgmr.msra.gmra.mrb[4].mxu1 %vm185_vm2, %v140_v18  ;;  %v170_v9 = vpack.c.bf16 %v162_v8, %v162_v8  ;;  %v933_v10 = vld [vmem:[#allocation11 + $0x8] sm:$0xf]  ;;  %v171_v13 = vpack.c.bf16 %v163_v12, %v163_v12  ;;  %v934_v14 = vld [vmem:[#allocation11 + $0xc] sm:$0xf]  ;;  %v172_v17 = vpack.c.bf16 %v164_v16, %v164_v16  ;;  %v935_v18 = vld [vmem:[#allocation11 + $0x10] sm:$0xf] }
  0x8c   :  { %2786 = vmatpush3.bf16.msra.mxu0 %v375_v19  ;;  %2792 = vmatpush3.bf16.msra.mxu1 %v421_v20  ;;  %v1035_v11 = vsel %vm189_vm1, %v933_v10, 0  ;;  %v1081_v15 = vsel %vm189_vm1, %v934_v14, 0  ;;  %v936_v19 = vld [vmem:[#allocation11 + $0x14] sm:$0xf]  ;;  %v1127_v20 = vsel %vm189_vm1, %v935_v18, 0  ;;  %v165_v22 = vld [vmem:[#allocation7 + $0x20] sm:$0xff] }
  0x8d   :  { %2787 = vmatprep.mubr.msk.bf16.mxu0 %vm3293_vm0, %v3292_v0  ;;  %2793 = vmatprep.mubr.msk.bf16.mxu1 %vm3293_vm0, %v3292_v0  ;;  %v1173_v21 = vsel %vm189_vm1, %v936_v19, 0  ;;  %v173_v23 = vpack.c.bf16 %v165_v22, %v165_v22  ;;  %v166_v24 = vld [vmem:[#allocation7 + $0x28] sm:$0xff]  ;;  %v167_v30 = vld [vmem:[#allocation7 + $0x30] sm:$0xff]  ;;  %v168_v32 = vld [vmem:[#allocation7 + $0x38] sm:$0xff] }
  0x8e   :  { %2797 = vmatprep.subr.bf16.mxu0 %v3292_v0  ;;  %2803 = vmatprep.subr.bf16.mxu1 %v3292_v0  ;;  %v175_v31 = vpack.c.bf16 %v167_v30, %v167_v30 }
  0x93   :  { %2788 = vmatmul.mubr.msk.bf16.vlgmr.msra.gmra.mrb[8].mxu0 %vm185_vm2, %v141_v25  ;;  %2794 = vmatmul.mubr.msk.bf16.vlgmr.msra.gmra.mrb[8].mxu1 %vm185_vm2, %v142_v26  ;;  %v174_v25 = vpack.c.bf16 %v166_v24, %v166_v24  ;;  %v937_v26 = vld [vmem:[#allocation11 + $0x18] sm:$0xf] }
  0x94   :  { %2798 = vmatpush3.bf16.msra.mxu0 %v467_v27  ;;  %2804 = vmatpush3.bf16.msra.mxu1 %v513_v28  ;;  %v938_v27 = vld [vmem:[#allocation11 + $0x1c] sm:$0xf]  ;;  %v1219_v28 = vsel %vm189_vm1, %v937_v26, 0 }
  0x95   :  { %2799 = vmatprep.mubr.msk.bf16.mxu0 %vm3293_vm0, %v3292_v0  ;;  %2805 = vmatprep.mubr.msk.bf16.mxu1 %vm3293_vm0, %v3292_v0  ;;  %v1265_v29 = vsel %vm189_vm1, %v938_v27, 0 }
  0x96   :  { %2809 = vmatprep.subr.bf16.mxu0 %v3292_v0  ;;  %2815 = vmatprep.subr.bf16.mxu1 %v3292_v0 }
  0x9b   :  { %2800 = vmatmul.mubr.msk.bf16.vlgmr.msra.gmra.mrb[12].mxu0 %vm185_vm2, %v143_v33  ;;  %2806 = vmatmul.mubr.msk.bf16.vlgmr.msra.gmra.mrb[12].mxu1 %vm185_vm2, %v144_v34  ;;  %v176_v33 = vpack.c.bf16 %v168_v32, %v168_v32 }
  0x9c   :  { %2810 = vmatpush3.bf16.msra.mxu0 %v567_v35  ;;  %2816 = vmatpush3.bf16.msra.mxu1 %v613_v36 }
  0x9d   :  { %2811 = vmatprep.mubr.msk.bf16.mxu0 %vm3293_vm0, %v3292_v0  ;;  %2817 = vmatprep.mubr.msk.bf16.mxu1 %vm3293_vm0, %v3292_v0 }
  0x9e   :  { %2821 = vmatprep.subr.bf16.mxu0 %v3292_v0  ;;  %2827 = vmatprep.subr.bf16.mxu1 %v3292_v0 }
  0xa3   :  { %2812 = vmatmul.mubr.msk.bf16.vlgmr.msra.gmra.mrb[16].mxu0 %vm185_vm2, %v153_v41  ;;  %2818 = vmatmul.mubr.msk.bf16.vlgmr.msra.gmra.mrb[16].mxu1 %vm185_vm2, %v154_v42 }
  0xa4   :  { %2822 = vmatpush3.bf16.msra.mxu0 %v659_v43  ;;  %2828 = vmatpush3.bf16.msra.mxu1 %v705_v44 }
  0xa5   :  { %2823 = vmatprep.mubr.msk.bf16.mxu0 %vm3293_vm0, %v3292_v0  ;;  %2829 = vmatprep.mubr.msk.bf16.mxu1 %vm3293_vm0, %v3292_v0 }
  0xa6   :  { %2833 = vmatprep.subr.bf16.mxu0 %v3292_v0  ;;  %2839 = vmatprep.subr.bf16.mxu1 %v3292_v0 }
  0xab   :  { %2824 = vmatmul.mubr.msk.bf16.vlgmr.msra.gmra.mrb[20].mxu0 %vm185_vm2, %v155_v49  ;;  %2830 = vmatmul.mubr.msk.bf16.vlgmr.msra.gmra.mrb[20].mxu1 %vm185_vm2, %v156_v50 }
  0xac   :  { %2834 = vmatpush3.bf16.msra.mxu0 %v751_v51  ;;  %2840 = vmatpush3.bf16.msra.mxu1 %v797_v52 }
  0xad   :  { %2835 = vmatprep.mubr.msk.bf16.mxu0 %vm3293_vm0, %v3292_v0  ;;  %2841 = vmatprep.mubr.msk.bf16.mxu1 %vm3293_vm0, %v3292_v0 }
  0xae   :  { %2845 = vmatprep.subr.bf16.mxu0 %v3292_v0  ;;  %2851 = vmatprep.subr.bf16.mxu1 %v3292_v0 }
  0xb3   :  { %2836 = vmatmul.mubr.msk.bf16.vlgmr.msra.gmra.mrb[24].mxu0 %vm185_vm2, %v157_v57  ;;  %2842 = vmatmul.mubr.msk.bf16.vlgmr.msra.gmra.mrb[24].mxu1 %vm185_vm2, %v158_v58 }
  0xb4   :  { %2846 = vmatpush3.bf16.msra.mxu0 %v843_v59  ;;  %2852 = vmatpush3.bf16.msra.mxu1 %v889_v60 }
  0xb5   :  { %2847 = vmatprep.mubr.msk.bf16.mxu0 %vm3293_vm0, %v3292_v0  ;;  %2853 = vmatprep.mubr.msk.bf16.mxu1 %vm3293_vm0, %v3292_v0 }
  0xb6   :  { %2857 = vmatprep.subr.bf16.mxu0 %v3292_v0  ;;  %2863 = vmatprep.subr.bf16.mxu1 %v3292_v0 }
  0xbb   :  { %2848 = vmatmul.mubr.msk.bf16.vlgmr.msra.gmra.mrb[28].mxu0 %vm185_vm2, %v159_v63  ;;  %2854 = vmatmul.mubr.msk.bf16.vlgmr.msra.gmra.mrb[28].mxu1 %vm185_vm2, %v160_v1 }
  0xbc   :  { %2859 = vmatprep.mubr.msk.bf16.mxu0 %vm3293_vm0, %v3292_v0  ;;  %2865 = vmatprep.mubr.msk.bf16.mxu1 %vm3293_vm0, %v3292_v0 }
  0xbd   :  { %2858 = vmatpush3.bf16.msra.mxu0 %v943_v3  ;;  %2864 = vmatpush3.bf16.msra.mxu1 %v989_v7 }
  0xbe   :  { %2869 = vmatprep.subr.bf16.mxu0 %v3292_v0  ;;  %2875 = vmatprep.subr.bf16.mxu1 %v3292_v0 }
  0xc3   :  { %2860 = vmatmul.mubr.msk.bf16.vlgmr.msra.gmra.mrb[32].mxu0 %vm185_vm2, %v169_v5  ;;  %2866 = vmatmul.mubr.msk.bf16.vlgmr.msra.gmra.mrb[32].mxu1 %vm185_vm2, %v170_v9 }
  0xc4   :  { %2871 = vmatprep.mubr.msk.bf16.mxu0 %vm3293_vm0, %v3292_v0  ;;  %2877 = vmatprep.mubr.msk.bf16.mxu1 %vm3293_vm0, %v3292_v0 }
  0xc5   :  { %2870 = vmatpush3.bf16.msra.mxu0 %v1035_v11  ;;  %2876 = vmatpush3.bf16.msra.mxu1 %v1081_v15 }
  0xc6   :  { %2881 = vmatprep.subr.bf16.mxu0 %v3292_v0  ;;  %2887 = vmatprep.subr.bf16.mxu1 %v3292_v0 }
  0xcb   :  { %2872 = vmatmul.mubr.msk.bf16.vlgmr.msra.gmra.mrb[36].mxu0 %vm185_vm2, %v171_v13  ;;  %2878 = vmatmul.mubr.msk.bf16.vlgmr.msra.gmra.mrb[36].mxu1 %vm185_vm2, %v172_v17 }
  0xcc   :  { %2883 = vmatprep.mubr.msk.bf16.mxu0 %vm3293_vm0, %v3292_v0  ;;  %2889 = vmatprep.mubr.msk.bf16.mxu1 %vm3293_vm0, %v3292_v0 }
  0xcd   :  { %2882 = vmatpush3.bf16.msra.mxu0 %v1127_v20  ;;  %2888 = vmatpush3.bf16.msra.mxu1 %v1173_v21 }
  0xce   :  { %2893 = vmatprep.subr.bf16.mxu0 %v3292_v0  ;;  %2899 = vmatprep.subr.bf16.mxu1 %v3292_v0 }
  0xd3   :  { %2884 = vmatmul.mubr.msk.bf16.vlgmr.msra.gmra.mrb[40].mxu0 %vm185_vm2, %v173_v23  ;;  %2890 = vmatmul.mubr.msk.bf16.vlgmr.msra.gmra.mrb[40].mxu1 %vm185_vm2, %v174_v25 }
  0xd4   :  { %2895 = vmatprep.mubr.msk.bf16.mxu0 %vm3293_vm0, %v3292_v0  ;;  %2894 = vmatpush3.bf16.msra.mxu0 %v1219_v28 }
  0xd5   :  { %2900 = vmatpush3.bf16.msra.mxu1 %v1265_v29  ;;  %2901 = vmatprep.mubr.msk.bf16.mxu1 %vm3293_vm0, %v3292_v0 }
  0xd6   :  { %2905 = vmatprep.subr.bf16.mxu0 %v3292_v0  ;;  %2911 = vmatprep.subr.bf16.mxu1 %v3292_v0 }
  0xdb   :  { %2896 = vmatmul.mubr.msk.bf16.vlgmr.msra.gmra.mrb[44].mxu0 %vm185_vm2, %v175_v31  ;;  %2902 = vmatmul.mubr.msk.bf16.vlgmr.msra.gmra.mrb[44].mxu1 %vm185_vm2, %v176_v33 }
  0xdc   :  { %2907 = vmatprep.mubr.msk.bf16.mxu0 %vm3293_vm0, %v3292_v0  ;;  %2913 = vmatprep.mubr.msk.bf16.mxu1 %vm3293_vm0, %v3292_v0 }
 0x156   :  { %v227_v34 = vpop.f32.mrb[0].mxu0  ;;  %v273_v35 = vpop.f32.mrb[0].mxu1 }
 0x157   :  { %v2765_v36 = vpop.f32.mrb[1].mxu0  ;;  %v2771_v37 = vpop.f32.mrb[1].mxu1  ;;  %v1307_v15 = vmul.f32 0.17677669, %v227_v34  ;;  %v1308_v16 = vmul.f32 0.17677669, %v273_v35 }
 0x158   :  { %v230_v38 = vpop.f32.mrb[2].mxu0  ;;  %v276_v39 = vpop.f32.mrb[2].mxu1 }
 0x159   :  { %v2766_v40 = vpop.f32.mrb[3].mxu0  ;;  %v2772_v41 = vpop.f32.mrb[3].mxu1  ;;  %v1315_v19 = vpack.c.bf16 %v1307_v15, %v1307_v15  ;;  %v1316_v20 = vpack.c.bf16 %v1308_v16, %v1308_v16 }
 0x15e   :  { %v319_v42 = vpop.f32.mrb[4].mxu0  ;;  %v365_v43 = vpop.f32.mrb[4].mxu1 }
 0x15f   :  { %v2777_v44 = vpop.f32.mrb[5].mxu0  ;;  %v2783_v45 = vpop.f32.mrb[5].mxu1  ;;  %v1309_v31 = vmul.f32 0.17677669, %v319_v42  ;;  %v1310_v32 = vmul.f32 0.17677669, %v365_v43 }
 0x160   :  { %v322_v46 = vpop.f32.mrb[6].mxu0  ;;  %v368_v47 = vpop.f32.mrb[6].mxu1 }
 0x161   :  { %v2778_v48 = vpop.f32.mrb[7].mxu0  ;;  %v2784_v49 = vpop.f32.mrb[7].mxu1  ;;  %v1317_v35 = vpack.c.bf16 %v1309_v31, %v1309_v31  ;;  %v1318_v36 = vpack.c.bf16 %v1310_v32, %v1310_v32 }
 0x166   :  { %v3597_v50 = vpop.f32.mrb[8].mxu0  ;;  %v3599_v51 = vpop.f32.mrb[8].mxu1 }
 0x167   :  { %v2789_v52 = vpop.f32.mrb[9].mxu0  ;;  %v2795_v53 = vpop.f32.mrb[9].mxu1  ;;  %v1311_v47 = vmul.f32 0.17677669, %v3597_v50  ;;  %v1312_v48 = vmul.f32 0.17677669, %v3599_v51 }
 0x168   :  { %v414_v54 = vpop.f32.mrb[10].mxu0  ;;  %v460_v55 = vpop.f32.mrb[10].mxu1 }
 0x169   :  { %v2790_v56 = vpop.f32.mrb[11].mxu0  ;;  %v2796_v57 = vpop.f32.mrb[11].mxu1  ;;  %v1319_v53 = vpack.c.bf16 %v1311_v47, %v1311_v47  ;;  %v1320_v54 = vpack.c.bf16 %v1312_v48, %v1312_v48 }
 0x16e   :  { %v3601_v58 = vpop.f32.mrb[12].mxu0  ;;  %v3603_v59 = vpop.f32.mrb[12].mxu1 }
 0x16f   :  { %v2801_v60 = vpop.f32.mrb[13].mxu0  ;;  %v2807_v61 = vpop.f32.mrb[13].mxu1 }
 0x170   :  { %v506_v62 = vpop.f32.mrb[14].mxu0  ;;  %v552_v63 = vpop.f32.mrb[14].mxu1 }
 0x171   :  { %v2802_v1 = vpop.f32.mrb[15].mxu0  ;;  %v2808_v2 = vpop.f32.mrb[15].mxu1 }
 0x172   :  { %v1313_v2 = vmul.f32 0.17677669, %v3601_v58 }
 0x176   :  { %v603_v3 = vpop.f32.mrb[16].mxu0  ;;  %v649_v4 = vpop.f32.mrb[16].mxu1 }
 0x177   :  { %v1323_v5 = vpack.c.bf16 %v603_v3, %v603_v3  ;;  %v1324_v6 = vpack.c.bf16 %v649_v4, %v649_v4  ;;  %v2813_v7 = vpop.f32.mrb[17].mxu0  ;;  %v2819_v8 = vpop.f32.mrb[17].mxu1  ;;  %v1314_v3 = vmul.f32 0.17677669, %v3603_v59  ;;  %v1321_v4 = vpack.c.bf16 %v1313_v2, %v1313_v2 }
 0x178   :  { %v606_v9 = vpop.f32.mrb[18].mxu0  ;;  %v652_v10 = vpop.f32.mrb[18].mxu1 }
 0x179   :  { %v1335_v11 = vsel %vm185_vm2, %v1323_v5, 0  ;;  %v1381_v12 = vsel %vm185_vm2, %v1324_v6, 0  ;;  %v2814_v13 = vpop.f32.mrb[19].mxu0  ;;  %v2820_v14 = vpop.f32.mrb[19].mxu1  ;;  %v1322_v5 = vpack.c.bf16 %v1314_v3, %v1314_v3  ;;  %v2647_v3 = vld [vmem:[%s3803_s8 + $0x1] ss:$0 sm:$0xff] }
 0x17a   :  { %2906 = vmatpush3.bf16.xpose.msra.mxu0 %v1335_v11  ;;  %2912 = vmatpush3.bf16.xpose.msra.mxu1 %v1381_v12 }
 0x17b   :  { %2917 = vmatprep.subr.bf16.mxu0 %v3292_v0  ;;  %2923 = vmatprep.subr.bf16.mxu1 %v3292_v0 }
 0x17e   :  { %v695_v17 = vpop.f32.mrb[20].mxu0  ;;  %v741_v18 = vpop.f32.mrb[20].mxu1 }
 0x17f   :  { %v1325_v21 = vpack.c.bf16 %v695_v17, %v695_v17  ;;  %v1326_v22 = vpack.c.bf16 %v741_v18, %v741_v18  ;;  %v2825_v23 = vpop.f32.mrb[21].mxu0  ;;  %v2831_v24 = vpop.f32.mrb[21].mxu1 }
 0x180   :  { %v698_v25 = vpop.f32.mrb[22].mxu0  ;;  %v744_v26 = vpop.f32.mrb[22].mxu1 }
 0x181   :  { %v1427_v27 = vsel %vm185_vm2, %v1325_v21, 0  ;;  %v1473_v28 = vsel %vm185_vm2, %v1326_v22, 0  ;;  %v2826_v29 = vpop.f32.mrb[23].mxu0  ;;  %2908 = vmatmul.mubr.msk.bf16.vlgmr.msra.gmra.mrb[48].mxu0 %vm185_vm2, %v1315_v19  ;;  %2914 = vmatmul.mubr.msk.bf16.vlgmr.msra.gmra.mrb[48].mxu1 %vm185_vm2, %v1316_v20  ;;  %v2832_v30 = vpop.f32.mrb[23].mxu1 }
 0x182   :  { %2918 = vmatpush3.bf16.xpose.msra.mxu0 %v1427_v27  ;;  %2924 = vmatpush3.bf16.xpose.msra.mxu1 %v1473_v28 }
 0x183   :  { %2919 = vmatprep.mubr.msk.bf16.mxu0 %vm3293_vm0, %v3292_v0  ;;  %2925 = vmatprep.mubr.msk.bf16.mxu1 %vm3293_vm0, %v3292_v0 }
 0x184   :  { %2929 = vmatprep.subr.bf16.mxu0 %v3292_v0  ;;  %2935 = vmatprep.subr.bf16.mxu1 %v3292_v0 }
 0x186   :  { %v787_v33 = vpop.f32.mrb[24].mxu0  ;;  %v833_v34 = vpop.f32.mrb[24].mxu1 }
 0x187   :  { %v1327_v37 = vpack.c.bf16 %v787_v33, %v787_v33  ;;  %v1328_v38 = vpack.c.bf16 %v833_v34, %v833_v34  ;;  %v2837_v39 = vpop.f32.mrb[25].mxu0  ;;  %v2843_v40 = vpop.f32.mrb[25].mxu1 }
 0x188   :  { %v790_v41 = vpop.f32.mrb[26].mxu0  ;;  %v836_v42 = vpop.f32.mrb[26].mxu1  ;;  %v2646_v40 = vld [vmem:[%s3803_s8] ss:$0 sm:$0xff] }
 0x189   :  { %v1519_v43 = vsel %vm185_vm2, %v1327_v37, 0  ;;  %v1565_v44 = vsel %vm185_vm2, %v1328_v38, 0  ;;  %v2838_v45 = vpop.f32.mrb[27].mxu0  ;;  %2920 = vmatmul.mubr.msk.bf16.vlgmr.msra.gmra.mrb[52].mxu0 %vm185_vm2, %v1317_v35  ;;  %2926 = vmatmul.mubr.msk.bf16.vlgmr.msra.gmra.mrb[52].mxu1 %vm185_vm2, %v1318_v36  ;;  %v2844_v46 = vpop.f32.mrb[27].mxu1 }
 0x18a   :  { %2930 = vmatpush3.bf16.xpose.msra.mxu0 %v1519_v43  ;;  %2936 = vmatpush3.bf16.xpose.msra.mxu1 %v1565_v44 }
 0x18b   :  { %2931 = vmatprep.mubr.msk.bf16.mxu0 %vm3293_vm0, %v3292_v0  ;;  %2937 = vmatprep.mubr.msk.bf16.mxu1 %vm3293_vm0, %v3292_v0 }
 0x18c   :  { %2941 = vmatprep.subr.bf16.mxu0 %v3292_v0  ;;  %2947 = vmatprep.subr.bf16.mxu1 %v3292_v0 }
 0x18e   :  { %v879_v49 = vpop.f32.mrb[28].mxu0  ;;  %v925_v52 = vpop.f32.mrb[28].mxu1 }
 0x18f   :  { %v1329_v55 = vpack.c.bf16 %v879_v49, %v879_v49  ;;  %v1330_v56 = vpack.c.bf16 %v925_v52, %v925_v52  ;;  %v2849_v57 = vpop.f32.mrb[29].mxu0  ;;  %v2855_v50 = vpop.f32.mrb[29].mxu1 }
 0x190   :  { %v882_v60 = vpop.f32.mrb[30].mxu0  ;;  %v928_v51 = vpop.f32.mrb[30].mxu1 }
 0x191   :  { %v1611_v61 = vsel %vm185_vm2, %v1329_v55, 0  ;;  %v1657_v62 = vsel %vm185_vm2, %v1330_v56, 0  ;;  %v2850_v63 = vpop.f32.mrb[31].mxu0  ;;  %2932 = vmatmul.mubr.msk.bf16.vlgmr.msra.gmra.mrb[56].mxu0 %vm185_vm2, %v1319_v53  ;;  %2938 = vmatmul.mubr.msk.bf16.vlgmr.msra.gmra.mrb[56].mxu1 %vm185_vm2, %v1320_v54  ;;  %v2856_v1 = vpop.f32.mrb[31].mxu1 }
 0x192   :  { %2942 = vmatpush3.bf16.xpose.msra.mxu0 %v1611_v61  ;;  %2948 = vmatpush3.bf16.xpose.msra.mxu1 %v1657_v62 }
 0x193   :  { %2943 = vmatprep.mubr.msk.bf16.mxu0 %vm3293_vm0, %v3292_v0  ;;  %2949 = vmatprep.mubr.msk.bf16.mxu1 %vm3293_vm0, %v3292_v0 }
 0x194   :  { %2953 = vmatprep.subr.bf16.mxu0 %v3292_v0  ;;  %2959 = vmatprep.subr.bf16.mxu1 %v3292_v0 }
 0x196   :  { %v979_v58 = vpop.f32.mrb[32].mxu0  ;;  %v1025_v10 = vpop.f32.mrb[32].mxu1 }
 0x197   :  { %v1801_v59 = vpack.c.bf16 %v979_v58, %v979_v58  ;;  %v2861_v6 = vpop.f32.mrb[33].mxu0  ;;  %v1802_v11 = vpack.c.bf16 %v1025_v10, %v1025_v10  ;;  %v2867_v12 = vpop.f32.mrb[33].mxu1 }
 0x198   :  { %v982_v7 = vpop.f32.mrb[34].mxu0  ;;  %v1028_v13 = vpop.f32.mrb[34].mxu1 }
 0x199   :  { %2944 = vmatmul.mubr.msk.bf16.vlgmr.msra.gmra.mrb[60].mxu0 %vm185_vm2, %v1321_v4  ;;  %2950 = vmatmul.mubr.msk.bf16.vlgmr.msra.gmra.mrb[60].mxu1 %vm185_vm2, %v1322_v5  ;;  %v1813_v8 = vsel %vm189_vm1, %v1801_v59, 0  ;;  %v2862_v9 = vpop.f32.mrb[35].mxu0  ;;  %v1859_v14 = vsel %vm189_vm1, %v1802_v11, 0  ;;  %v2868_v15 = vpop.f32.mrb[35].mxu1 }
 0x19a   :  { %2955 = vmatprep.mubr.msk.bf16.mxu0 %vm3293_vm0, %v3292_v0  ;;  %2961 = vmatprep.mubr.msk.bf16.mxu1 %vm3293_vm0, %v3292_v0 }
 0x19b   :  { %2954 = vmatpush3.bf16.msra.mxu0 %v1813_v8  ;;  %2960 = vmatpush3.bf16.msra.mxu1 %v1859_v14 }
 0x19c   :  { %2965 = vmatprep.subr.bf16.mxu0 %v3292_v0  ;;  %2971 = vmatprep.subr.bf16.mxu1 %v3292_v0 }
 0x19e   :  { %v3652_v16 = vpop.f32.mrb[36].mxu0  ;;  %v3655_v20 = vpop.f32.mrb[36].mxu1 }
 0x19f   :  { %v2873_v17 = vpop.f32.mrb[37].mxu0  ;;  %v2879_v21 = vpop.f32.mrb[37].mxu1 }
 0x1a0   :  { %v1074_v18 = vpop.f32.mrb[38].mxu0  ;;  %v1120_v22 = vpop.f32.mrb[38].mxu1 }
 0x1a1   :  { %v2874_v19 = vpop.f32.mrb[39].mxu0  ;;  %v2880_v23 = vpop.f32.mrb[39].mxu1 }
 0x1a6   :  { %v3657_v24 = vpop.f32.mrb[40].mxu0  ;;  %v3659_v28 = vpop.f32.mrb[40].mxu1 }
 0x1a7   :  { %v2885_v25 = vpop.f32.mrb[41].mxu0  ;;  %v2891_v29 = vpop.f32.mrb[41].mxu1 }
 0x1a8   :  { %v1166_v26 = vpop.f32.mrb[42].mxu0  ;;  %v1212_v30 = vpop.f32.mrb[42].mxu1 }
 0x1a9   :  { %v2886_v27 = vpop.f32.mrb[43].mxu0  ;;  %v2892_v31 = vpop.f32.mrb[43].mxu1 }
 0x1ae   :  { %v3661_v32 = vpop.f32.mrb[44].mxu0  ;;  %v3663_v36 = vpop.f32.mrb[44].mxu1 }
 0x1af   :  { %v2897_v33 = vpop.f32.mrb[45].mxu0  ;;  %v2903_v37 = vpop.f32.mrb[45].mxu1 }
 0x1b0   :  { %v1258_v34 = vpop.f32.mrb[46].mxu0  ;;  %v1304_v38 = vpop.f32.mrb[46].mxu1 }
 0x1b1   :  { %v2898_v35 = vpop.f32.mrb[47].mxu0  ;;  %v2904_v39 = vpop.f32.mrb[47].mxu1 }
 0x254   :  { %v1371_v41 = vpop.f32.mrb[48].mxu0  ;;  %v1417_v42 = vpop.f32.mrb[48].mxu1 }
 0x255   :  { %v1713_v43 = vadd.f32 %v2646_v40, %v1371_v41  ;;  %v2909_v44 = vpop.f32.mrb[49].mxu0  ;;  %v2915_v45 = vpop.f32.mrb[49].mxu1  ;;  %v1714_v48 = vadd.f32 %v2646_v40, %v1417_v42 }
 0x256   :  { %v1374_v46 = vpop.f32.mrb[50].mxu0  ;;  %v1420_v47 = vpop.f32.mrb[50].mxu1  ;;  %v1803_v45 = vpack.c.bf16 %v3652_v16, %v3652_v16 }
 0x257   :  { %v2910_v49 = vpop.f32.mrb[51].mxu0  ;;  %v2916_v52 = vpop.f32.mrb[51].mxu1  ;;  %v1721_v53 = vsel %vm185_vm2, %v1713_v43, -inf  ;;  %v1724_v54 = vsel %vm185_vm2, %v1714_v48, -inf }
 0x258   :  { %1722 = vmax.xlane.f32.xlu0 %v1721_v53 }
 0x25c   :  { %v1509_v55 = vpop.f32.mrb[52].mxu1  ;;  %1725 = vmax.xlane.f32.xlu0 %v1724_v54  ;;  %v1463_v56 = vpop.f32.mrb[52].mxu0 }
 0x25d   :  { %v1715_v57 = vadd.f32 %v2646_v40, %v1463_v56  ;;  %v2921_v50 = vpop.f32.mrb[53].mxu0  ;;  %v2927_v60 = vpop.f32.mrb[53].mxu1  ;;  %v1716_v62 = vadd.f32 %v2646_v40, %v1509_v55  ;;  %v1905_v55 = vsel %vm189_vm1, %v1803_v45, 0  ;;  %v1804_v56 = vpack.c.bf16 %v3655_v20, %v3655_v20 }
 0x25e   :  { %v1466_v51 = vpop.f32.mrb[54].mxu0  ;;  %v1512_v61 = vpop.f32.mrb[54].mxu1  ;;  %v1805_v20 = vpack.c.bf16 %v3657_v24, %v3657_v24 }
 0x25f   :  { %v2922_v63 = vpop.f32.mrb[55].mxu0  ;;  %v2928_v1 = vpop.f32.mrb[55].mxu1  ;;  %v1727_v2 = vsel %vm185_vm2, %v1715_v57, -inf  ;;  %v1730_v4 = vsel %vm185_vm2, %v1716_v62, -inf  ;;  %v1951_v61 = vsel %vm189_vm1, %v1804_v56, 0 }
 0x260   :  { %1728 = vmax.xlane.f32.xlu1 %v1727_v2  ;;  %v1997_v24 = vsel %vm189_vm1, %v1805_v20, 0 }
 0x264   :  { %v1601_v5 = vpop.f32.mrb[56].mxu1  ;;  %1731 = vmax.xlane.f32.xlu1 %v1730_v4  ;;  %v1555_v58 = vpop.f32.mrb[56].mxu0 }
 0x265   :  { %v1718_v59 = vadd.f32 %v2647_v3, %v1601_v5  ;;  %v1717_v6 = vadd.f32 %v2647_v3, %v1555_v58  ;;  %v2933_v7 = vpop.f32.mrb[57].mxu0  ;;  %v2939_v8 = vpop.f32.mrb[57].mxu1  ;;  %v1806_v58 = vpack.c.bf16 %v3659_v28, %v3659_v28 }
 0x266   :  { %v1558_v9 = vpop.f32.mrb[58].mxu0  ;;  %v1604_v10 = vpop.f32.mrb[58].mxu1 }
 0x267   :  { %v2934_v11 = vpop.f32.mrb[59].mxu0  ;;  %v2940_v12 = vpop.f32.mrb[59].mxu1  ;;  %v1736_v13 = vsel %vm185_vm2, %v1718_v59, -inf  ;;  %v1733_v14 = vsel %vm185_vm2, %v1717_v6, -inf  ;;  %v2043_v10 = vsel %vm189_vm1, %v1806_v58, 0 }
 0x268   :  { %1737 = vmax.xlane.f32.xlu1 %v1736_v13  ;;  %1734 = vmax.xlane.f32.xlu0 %v1733_v14  ;;  %v1807_v11 = vpack.c.bf16 %v3661_v32, %v3661_v32  ;;  %v2206_v58 = vld [vmem:[#allocation13 + $0x14] sm:$0xf] }
 0x26c   :  { %v1647_v15 = vpop.f32.mrb[60].mxu0  ;;  %v1693_v17 = vpop.f32.mrb[60].mxu1 }
 0x26d   :  { %v3677_v18 = vadd.f32 %v2647_v3, %v1647_v15  ;;  %v3679_v19 = vadd.f32 %v2647_v3, %v1693_v17  ;;  %v2945_v21 = vpop.f32.mrb[61].mxu0  ;;  %v2951_v22 = vpop.f32.mrb[61].mxu1  ;;  %v1808_v17 = vpack.c.bf16 %v3663_v36, %v3663_v36 }
 0x26e   :  { %v1650_v23 = vpop.f32.mrb[62].mxu0  ;;  %v1696_v25 = vpop.f32.mrb[62].mxu1 }
 0x26f   :  { %v2946_v26 = vpop.f32.mrb[63].mxu0  ;;  %v2952_v27 = vpop.f32.mrb[63].mxu1  ;;  %v1742_v29 = vsel %vm185_vm2, %v3679_v19, -inf  ;;  %v1739_v30 = vsel %vm185_vm2, %v3677_v18, -inf }
 0x270   :  { %1743 = vmax.xlane.f32.xlu1 %v1742_v29  ;;  %1740 = vmax.xlane.f32.xlu0 %v1739_v30  ;;  %v2201_v27 = vld [vmem:[#allocation13] sm:$0xf]  ;;  %v2202_v30 = vld [vmem:[#allocation13 + $0x4] sm:$0xf] }
 0x271   :  { %v2213_v29 = vsel %vm189_vm1, %v2201_v27, 0 }
 0x2e5   :  { %v1723_v31 = vpop.xlane.xlu0 %1722 }
 0x2e6   :  { %v1745_v33 = vsub.f32 %v1713_v43, %v1723_v31  ;;  %v2259_v31 = vsel %vm189_vm1, %v2202_v30, 0 }
 0x2e8   :  { %v1753_v34 = vmul.f32 1.442695, %v1745_v33 }
 0x2e9   :  { %v1726_v35 = vpop.xlane.xlu0 %1725 }
 0x2ea   :  { %3063 = vpow2.f32 %v1753_v34  ;;  %v1746_v37 = vsub.f32 %v1714_v48, %v1726_v35 }
 0x2ec   :  { %v1755_v38 = vmul.f32 1.442695, %v1746_v37 }
 0x2ed   :  { %v1729_v39 = vpop.xlane.xlu1 %1728 }
 0x2ee   :  { %3065 = vpow2.f32 %v1755_v38  ;;  %v1747_v40 = vsub.f32 %v1715_v57, %v1729_v39 }
 0x2f0   :  { %v1757_v41 = vmul.f32 1.442695, %v1747_v40  ;;  %v2203_v40 = vld [vmem:[#allocation13 + $0x8] sm:$0xf] }
 0x2f1   :  { %v1732_v42 = vpop.xlane.xlu1 %1731 }
 0x2f2   :  { %3067 = vpow2.f32 %v1757_v41  ;;  %v1748_v44 = vsub.f32 %v1716_v62, %v1732_v42 }
 0x2f4   :  { %v3064_v46 = vpop.eup %3063  ;;  %v1759_v47 = vmul.f32 1.442695, %v1748_v44 }
 0x2f5   :  { %v1738_v49 = vpop.xlane.xlu1 %1737  ;;  %v1735_v52 = vpop.xlane.xlu0 %1734  ;;  %v1769_v43 = vsel %vm185_vm2, %v3064_v46, 0.0  ;;  %v1793_v53 = vpack.c.bf16 %v3064_v46, %v3064_v46 }
 0x2f6   :  { %3069 = vpow2.f32 %v1759_v47  ;;  %v1750_v48 = vsub.f32 %v1718_v59, %v1738_v49  ;;  %v1749_v54 = vsub.f32 %v1717_v6, %v1735_v52  ;;  %1770 = vadd.xlane.f32.xlu0 %v1769_v43  ;;  %v2305_v47 = vsel %vm189_vm1, %v2203_v40, 0 }
 0x2f7   :  { %2956 = vmatmul.mubr.msk.bf16.vlgmr.msra.gmra.mrb[64].mxu0 %vm185_vm2, %v1793_v53  ;;  %v2204_v53 = vld [vmem:[#allocation13 + $0xc] sm:$0xf] }
 0x2f8   :  { %v3066_v57 = vpop.eup %3065  ;;  %v1763_v16 = vmul.f32 1.442695, %v1750_v48  ;;  %v1761_v50 = vmul.f32 1.442695, %v1749_v54  ;;  %2966 = vmatpush3.bf16.msra.mxu0 %v1905_v55  ;;  %2967 = vmatprep.mubr.msk.bf16.mxu0 %vm3293_vm0, %v3292_v0 }
 0x2f9   :  { %v1772_v60 = vsel %vm185_vm2, %v3066_v57, 0.0  ;;  %v1794_v51 = vpack.c.bf16 %v3066_v57, %v3066_v57  ;;  %2977 = vmatprep.subr.bf16.mxu0 %v3292_v0 }
 0x2fa   :  { %3071 = vpow2.f32 %v1763_v16  ;;  %1773 = vadd.xlane.f32.xlu1 %v1772_v60 }
 0x2fb   :  { %3073 = vpow2.f32 %v1761_v50  ;;  %2962 = vmatmul.mubr.msk.bf16.vlgmr.msra.gmra.mrb[64].mxu1 %vm185_vm2, %v1794_v51  ;;  %v2351_v50 = vsel %vm189_vm1, %v2204_v53, 0 }
 0x2fc   :  { %v3068_v62 = vpop.eup %3067  ;;  %2972 = vmatpush3.bf16.msra.mxu1 %v1951_v61  ;;  %2973 = vmatprep.mubr.msk.bf16.mxu1 %vm3293_vm0, %v3292_v0  ;;  %v2205_v61 = vld [vmem:[#allocation13 + $0x10] sm:$0xf] }
 0x2fd   :  { %v1744_v63 = vpop.xlane.xlu1 %1743  ;;  %v1741_v1 = vpop.xlane.xlu0 %1740  ;;  %v1775_v2 = vsel %vm185_vm2, %v3068_v62, 0.0  ;;  %v1795_v3 = vpack.c.bf16 %v3068_v62, %v3068_v62  ;;  %2983 = vmatprep.subr.bf16.mxu1 %v3292_v0 }
 0x2fe   :  { %v1752_v4 = vsub.f32 %v3679_v19, %v1744_v63  ;;  %v1751_v5 = vsub.f32 %v3677_v18, %v1741_v1  ;;  %1776 = vadd.xlane.f32.xlu0 %v1775_v2  ;;  %v2089_v18 = vsel %vm189_vm1, %v1807_v11, 0  ;;  %v2135_v19 = vsel %vm189_vm1, %v1808_v17, 0 }
 0x2ff   :  { %2968 = vmatmul.mubr.msk.bf16.vlgmr.msra.gmra.mrb[68].mxu0 %vm185_vm2, %v1795_v3  ;;  %v2397_v3 = vsel %vm189_vm1, %v2205_v61, 0 }
 0x300   :  { %v3070_v59 = vpop.eup %3069  ;;  %v1767_v6 = vmul.f32 1.442695, %v1752_v4  ;;  %v1765_v7 = vmul.f32 1.442695, %v1751_v5  ;;  %2978 = vmatpush3.bf16.msra.mxu0 %v1997_v24  ;;  %2979 = vmatprep.mubr.msk.bf16.mxu0 %vm3293_vm0, %v3292_v0 }
 0x301   :  { %v1778_v8 = vsel %vm185_vm2, %v3070_v59, 0.0  ;;  %v1796_v9 = vpack.c.bf16 %v3070_v59, %v3070_v59  ;;  %2989 = vmatprep.subr.bf16.mxu0 %v3292_v0 }
 0x302   :  { %3075 = vpow2.f32 %v1767_v6  ;;  %1779 = vadd.xlane.f32.xlu1 %v1778_v8 }
 0x303   :  { %3077 = vpow2.f32 %v1765_v7  ;;  %2974 = vmatmul.mubr.msk.bf16.vlgmr.msra.gmra.mrb[68].mxu1 %vm185_vm2, %v1796_v9 }
 0x304   :  { %v3072_v28 = vpop.eup %3071  ;;  %2984 = vmatpush3.bf16.msra.mxu1 %v2043_v10  ;;  %2985 = vmatprep.mubr.msk.bf16.mxu1 %vm3293_vm0, %v3292_v0 }
 0x305   :  { %v3074_v12 = vpop.eup %3073  ;;  %v1784_v13 = vsel %vm185_vm2, %v3072_v28, 0.0  ;;  %2995 = vmatprep.subr.bf16.mxu1 %v3292_v0  ;;  %v1798_v32 = vpack.c.bf16 %v3072_v28, %v3072_v28  ;;  %v2443_v28 = vsel %vm189_vm1, %v2206_v58, 0 }
 0x306   :  { %1785 = vadd.xlane.f32.xlu1 %v1784_v13  ;;  %v1781_v14 = vsel %vm185_vm2, %v3074_v12, 0.0  ;;  %v1797_v15 = vpack.c.bf16 %v3074_v12, %v3074_v12  ;;  %v2207_v13 = vld [vmem:[#allocation13 + $0x18] sm:$0xf] }
 0x307   :  { %1782 = vadd.xlane.f32.xlu0 %v1781_v14 }
 0x308   :  { %2980 = vmatmul.mubr.msk.bf16.vlgmr.msra.gmra.mrb[72].mxu0 %vm185_vm2, %v1797_v15 }
 0x309   :  { %2990 = vmatpush3.bf16.msra.mxu0 %v2089_v18  ;;  %2991 = vmatprep.mubr.msk.bf16.mxu0 %vm3293_vm0, %v3292_v0 }
 0x30a   :  { %3001 = vmatprep.subr.bf16.mxu0 %v3292_v0 }
 0x30b   :  { %2986 = vmatmul.mubr.msk.bf16.vlgmr.msra.gmra.mrb[72].mxu1 %vm185_vm2, %v1798_v32 }
 0x30c   :  { %v3076_v21 = vpop.eup %3075  ;;  %2996 = vmatpush3.bf16.msra.mxu1 %v2135_v19  ;;  %2997 = vmatprep.mubr.msk.bf16.mxu1 %vm3293_vm0, %v3292_v0 }
 0x30d   :  { %v3078_v36 = vpop.eup %3077  ;;  %v1790_v22 = vsel %vm185_vm2, %v3076_v21, 0.0  ;;  %3007 = vmatprep.subr.bf16.mxu1 %v3292_v0  ;;  %v1800_v26 = vpack.c.bf16 %v3076_v21, %v3076_v21 }
 0x30e   :  { %1791 = vadd.xlane.f32.xlu1 %v1790_v22  ;;  %v1787_v23 = vsel %vm185_vm2, %v3078_v36, 0.0  ;;  %v1799_v25 = vpack.c.bf16 %v3078_v36, %v3078_v36  ;;  %v2489_v36 = vsel %vm189_vm1, %v2207_v13, 0  ;;  %v2208_v22 = vld [vmem:[#allocation13 + $0x1c] sm:$0xf] }
 0x30f   :  { %1788 = vadd.xlane.f32.xlu0 %v1787_v23  ;;  %v2535_v30 = vsel %vm189_vm1, %v2208_v22, 0 }
 0x310   :  { %2992 = vmatmul.mubr.msk.bf16.vlgmr.msra.gmra.mrb[76].mxu0 %vm185_vm2, %v1799_v25 }
 0x311   :  { %3003 = vmatprep.mubr.msk.bf16.mxu0 %vm3293_vm0, %v3292_v0  ;;  %3002 = vmatpush3.bf16.msra.mxu0 %v2213_v29 }
 0x312   :  { %3013 = vmatprep.subr.bf16.mxu0 %v3292_v0 }
 0x313   :  { %2998 = vmatmul.mubr.msk.bf16.vlgmr.msra.gmra.mrb[76].mxu1 %vm185_vm2, %v1800_v26 }
 0x314   :  { %3009 = vmatprep.mubr.msk.bf16.mxu1 %vm3293_vm0, %v3292_v0  ;;  %3008 = vmatpush3.bf16.msra.mxu1 %v2259_v31 }
 0x315   :  { %3019 = vmatprep.subr.bf16.mxu1 %v3292_v0 }
 0x383   :  { %v1771_v33 = vpop.xlane.xlu0 %1770 }
 0x384   :  { %3079 = vrcp.f32 %v1771_v33 }
 0x387   :  { %v1774_v34 = vpop.xlane.xlu1 %1773 }
 0x388   :  { %3081 = vrcp.f32 %v1774_v34 }
 0x38b   :  { %v1777_v35 = vpop.xlane.xlu0 %1776 }
 0x38c   :  { %3083 = vrcp.f32 %v1777_v35 }
 0x38e   :  { %v3080_v38 = vpop.eup %3079 }
 0x38f   :  { %v1780_v37 = vpop.xlane.xlu1 %1779 }
 0x390   :  { %3085 = vrcp.f32 %v1780_v37 }
 0x392   :  { %v3082_v49 = vpop.eup %3081 }
 0x393   :  { %v1786_v56 = vpop.xlane.xlu1 %1785 }
 0x394   :  { %v1783_v52 = vpop.xlane.xlu0 %1782 }
 0x395   :  { %3087 = vrcp.f32 %v1783_v52 }
 0x396   :  { %v3084_v60 = vpop.eup %3083  ;;  %3089 = vrcp.f32 %v1786_v56 }
 0x39a   :  { %v3086_v4 = vpop.eup %3085 }
 0x39b   :  { %v1792_v8 = vpop.xlane.xlu1 %1791 }
 0x39c   :  { %v1789_v5 = vpop.xlane.xlu0 %1788 }
 0x39d   :  { %3091 = vrcp.f32 %v1789_v5 }
 0x39e   :  { %3093 = vrcp.f32 %v1792_v8 }
 0x39f   :  { %v3088_v11 = vpop.eup %3087 }
 0x3a0   :  { %v3090_v18 = vpop.eup %3089 }
 0x3a7   :  { %v3092_v31 = vpop.eup %3091 }
 0x3ca   :  { %v1849_v39 = vpop.f32.mrb[64].mxu0 }
 0x3cb   :  { %v2185_v41 = vmul.f32 %v3080_v38, %v1849_v39  ;;  %v2957_v42 = vpop.f32.mrb[65].mxu0  ;;  %v3094_v38 = vpop.eup %3093 }
 0x3cc   :  { %v1852_v44 = vpop.f32.mrb[66].mxu0 }
 0x3cd   :  { %v2193_v45 = vpack.c.bf16 %v2185_v41, %v2185_v41  ;;  %v2958_v46 = vpop.f32.mrb[67].mxu0 }
 0x3ce   :  { %v1895_v43 = vpop.f32.mrb[64].mxu1 }
 0x3cf   :  { %v2186_v48 = vmul.f32 %v3082_v49, %v1895_v43  ;;  %v2963_v54 = vpop.f32.mrb[65].mxu1  ;;  %3004 = vmatmul.mubr.msk.bf16.vlgmr.msra.gmra.mrb[80].mxu0 %vm185_vm2, %v2193_v45 }
 0x3d0   :  { %v1898_v55 = vpop.f32.mrb[66].mxu1  ;;  %3014 = vmatpush3.bf16.msra.mxu0 %v2305_v47  ;;  %3015 = vmatprep.mubr.msk.bf16.mxu0 %vm3293_vm0, %v3292_v0 }
 0x3d1   :  { %v2194_v57 = vpack.c.bf16 %v2186_v48, %v2186_v48  ;;  %v2964_v16 = vpop.f32.mrb[67].mxu1  ;;  %3025 = vmatprep.subr.bf16.mxu0 %v3292_v0 }
 0x3d2   :  { %v1941_v51 = vpop.f32.mrb[68].mxu0 }
 0x3d3   :  { %v2187_v20 = vmul.f32 %v3084_v60, %v1941_v51  ;;  %v2969_v62 = vpop.f32.mrb[69].mxu0  ;;  %3010 = vmatmul.mubr.msk.bf16.vlgmr.msra.gmra.mrb[80].mxu1 %vm185_vm2, %v2194_v57 }
 0x3d4   :  { %v1944_v63 = vpop.f32.mrb[70].mxu0  ;;  %3020 = vmatpush3.bf16.msra.mxu1 %v2351_v50  ;;  %3021 = vmatprep.mubr.msk.bf16.mxu1 %vm3293_vm0, %v3292_v0 }
 0x3d5   :  { %v2195_v1 = vpack.c.bf16 %v2187_v20, %v2187_v20  ;;  %v2970_v2 = vpop.f32.mrb[71].mxu0  ;;  %3031 = vmatprep.subr.bf16.mxu1 %v3292_v0  ;;  %v2664_v20 = vld [vmem:[%s3802_s7] ss:$0 sm:$0xff]  ;;  %s3294_s7 = smov [#allocation14]  }
 0x3d6   :  { %v1987_v24 = vpop.f32.mrb[68].mxu1  ;;  %s2599_s15 = sshll.u32 %s3294_s7, 4  ;;  %s2600_s15 = int_to_ptr.vmem [resolvable:$true] %s2599_s15 }
 0x3d7   :  { %v2188_v59 = vmul.f32 %v3086_v4, %v1987_v24  ;;  %v2975_v6 = vpop.f32.mrb[69].mxu1  ;;  %3016 = vmatmul.mubr.msk.bf16.vlgmr.msra.gmra.mrb[84].mxu0 %vm185_vm2, %v2195_v1  ;;  %s3249_s16 = scalar_lea.vmem %s2600_s15, 256  ;;  %p3254_p1 = scmp.lt.s32.totalorder %s2600_s15, %s2600_s15 }
 0x3d8   :  { %v1990_v7 = vpop.f32.mrb[70].mxu1  ;;  %3026 = vmatpush3.bf16.msra.mxu0 %v2397_v3  ;;  %3027 = vmatprep.mubr.msk.bf16.mxu0 %vm3293_vm0, %v3292_v0  ;;  %p3250_p0 = scmp.ne.s32.totalorder %s2600_s15, %s3249_s16  ;;  %p3255_p2 = scmp.lt.s32.totalorder %s3249_s16, %s3249_s16 }
 0x3d9   :  { %v2196_v9 = vpack.c.bf16 %v2188_v59, %v2188_v59  ;;  %v2976_v10 = vpop.f32.mrb[71].mxu1  ;;  %3037 = vmatprep.subr.bf16.mxu0 %v3292_v0 }
 0x3da   :  { %p3256_p3 = por %p3255_p2, %p3254_p1 }
 0x3db   :  { %v2033_v12 = vpop.f32.mrb[72].mxu0  ;;  %3022 = vmatmul.mubr.msk.bf16.vlgmr.msra.gmra.mrb[84].mxu1 %vm185_vm2, %v2196_v9 }
 0x3dc   :  { %v2189_v14 = vmul.f32 %v3088_v11, %v2033_v12  ;;  %v2981_v15 = vpop.f32.mrb[73].mxu0  ;;  %3032 = vmatpush3.bf16.msra.mxu1 %v2443_v28  ;;  %3033 = vmatprep.mubr.msk.bf16.mxu1 %vm3293_vm0, %v3292_v0  ;;  %p3257_p4 = pnand %p3256_p3, %p3250_p0 }
 0x3dd   :  { %v2036_v17 = vpop.f32.mrb[74].mxu0  ;;  %3043 = vmatprep.subr.bf16.mxu1 %v3292_v0 }
 0x3de   :  { %v2197_v32 = vpack.c.bf16 %v2189_v14, %v2189_v14  ;;  %v2982_v19 = vpop.f32.mrb[75].mxu0  ;;  %v2079_v21 = vpop.f32.mrb[72].mxu1 }
 0x3df   :  { %v2190_v23 = vmul.f32 %v3090_v18, %v2079_v21  ;;  %v2987_v25 = vpop.f32.mrb[73].mxu1 }
 0x3e0   :  { %3028 = vmatmul.mubr.msk.bf16.vlgmr.msra.gmra.mrb[88].mxu0 %vm185_vm2, %v2197_v32  ;;  %v2082_v26 = vpop.f32.mrb[74].mxu1 }
 0x3e1   :  { %v2198_v27 = vpack.c.bf16 %v2190_v23, %v2190_v23  ;;  %v2988_v29 = vpop.f32.mrb[75].mxu1  ;;  %3038 = vmatpush3.bf16.msra.mxu0 %v2489_v36  ;;  %3039 = vmatprep.mubr.msk.bf16.mxu0 %vm3293_vm0, %v3292_v0 }
 0x3e3   :  { %v2125_v33 = vpop.f32.mrb[76].mxu0  ;;  %3034 = vmatmul.mubr.msk.bf16.vlgmr.msra.gmra.mrb[88].mxu1 %vm185_vm2, %v2198_v27 }
 0x3e4   :  { %v2191_v34 = vmul.f32 %v3092_v31, %v2125_v33  ;;  %v2993_v35 = vpop.f32.mrb[77].mxu0  ;;  %3044 = vmatpush3.bf16.msra.mxu1 %v2535_v30  ;;  %3045 = vmatprep.mubr.msk.bf16.mxu1 %vm3293_vm0, %v3292_v0 }
 0x3e5   :  { %v2128_v37 = vpop.f32.mrb[78].mxu0 }
 0x3e6   :  { %v2199_v39 = vpack.c.bf16 %v2191_v34, %v2191_v34  ;;  %v2994_v40 = vpop.f32.mrb[79].mxu0  ;;  %v2171_v41 = vpop.f32.mrb[76].mxu1 }
 0x3e7   :  { %v2192_v42 = vmul.f32 %v3094_v38, %v2171_v41  ;;  %v2999_v44 = vpop.f32.mrb[77].mxu1 }
 0x3e8   :  { %3040 = vmatmul.mubr.msk.bf16.vlgmr.msra.gmra.mrb[92].mxu0 %vm185_vm2, %v2199_v39  ;;  %v2174_v45 = vpop.f32.mrb[78].mxu1 }
 0x3e9   :  { %v2200_v46 = vpack.c.bf16 %v2192_v42, %v2192_v42  ;;  %v3000_v47 = vpop.f32.mrb[79].mxu1 }
 0x3eb   :  { %3046 = vmatmul.mubr.msk.bf16.vlgmr.msra.gmra.mrb[92].mxu1 %vm185_vm2, %v2200_v46 }
 0x4a2   :  { %v2249_v49 = vpop.f32.mrb[80].mxu0 }
 0x4a3   :  { %v3005_v52 = vpop.f32.mrb[81].mxu0 }
 0x4a4   :  { %v2252_v43 = vpop.f32.mrb[82].mxu0 }
 0x4a5   :  { %v3006_v53 = vpop.f32.mrb[83].mxu0 }
 0x4a6   :  { %v2295_v48 = vpop.f32.mrb[80].mxu1 }
 0x4a7   :  { %v2577_v0 = vadd.f32 %v2295_v48, %v2249_v49  ;;  %v3011_v54 = vpop.f32.mrb[81].mxu1 }
 0x4a8   :  { %v2298_v55 = vpop.f32.mrb[82].mxu1 }
 0x4a9   :  { %v3012_v56 = vpop.f32.mrb[83].mxu1 }
 0x4aa   :  { %v2341_v57 = vpop.f32.mrb[84].mxu0 }
 0x4ab   :  { %v2578_v16 = vadd.f32 %v2577_v0, %v2341_v57  ;;  %v3017_v50 = vpop.f32.mrb[85].mxu0 }
 0x4ac   :  { %v2344_v60 = vpop.f32.mrb[86].mxu0 }
 0x4ad   :  { %v3018_v51 = vpop.f32.mrb[87].mxu0 }
 0x4ae   :  { %v2387_v61 = vpop.f32.mrb[84].mxu1 }
 0x4af   :  { %v2579_v62 = vadd.f32 %v2578_v16, %v2387_v61  ;;  %v3023_v63 = vpop.f32.mrb[85].mxu1 }
 0x4b0   :  { %v2390_v1 = vpop.f32.mrb[86].mxu1 }
 0x4b1   :  { %v2590_v2 = vadd.f32 %v2664_v20, %v2579_v62  ;;  %v3024_v3 = vpop.f32.mrb[87].mxu1 }
 0x4b3   :  { %2592 = vst [vmem:[#allocation14] sm:$0xff] %v2590_v2  ;;  %v2433_v4 = vpop.f32.mrb[88].mxu0 }
 0x4b4   :  { %v3029_v5 = vpop.f32.mrb[89].mxu0 }
 0x4b5   :  { %v2436_v24 = vpop.f32.mrb[90].mxu0 }
 0x4b6   :  { %v3030_v58 = vpop.f32.mrb[91].mxu0  ;;  %v2479_v59 = vpop.f32.mrb[88].mxu1 }
 0x4b7   :  { %v2580_v6 = vadd.f32 %v2479_v59, %v2433_v4  ;;  %v3035_v7 = vpop.f32.mrb[89].mxu1 }
 0x4b8   :  { %v2482_v8 = vpop.f32.mrb[90].mxu1 }
 0x4b9   :  { %v3036_v9 = vpop.f32.mrb[91].mxu1 }
 0x4bb   :  { %v2525_v10 = vpop.f32.mrb[92].mxu0 }
 0x4bc   :  { %v2581_v28 = vadd.f32 %v2580_v6, %v2525_v10  ;;  %v3041_v11 = vpop.f32.mrb[93].mxu0 }
 0x4bd   :  { %v2528_v12 = vpop.f32.mrb[94].mxu0 }
 0x4be   :  { %v3042_v13 = vpop.f32.mrb[95].mxu0  ;;  %v2571_v14 = vpop.f32.mrb[92].mxu1 }
 0x4bf   :  { %v2582_v15 = vadd.f32 %v2581_v28, %v2571_v14  ;;  %v3047_v17 = vpop.f32.mrb[93].mxu1 }
 0x4c0   :  { %v2574_v18 = vpop.f32.mrb[94].mxu1 }
 0x4c1   :  { %v2591_v32 = vadd.f32 %v2664_v20, %v2582_v15  ;;  %v3048_v19 = vpop.f32.mrb[95].mxu1 }
 0x4c3   :  { %2593 = vst [vmem:[#allocation14 + $0x8] sm:$0xff] %v2591_v32 }
 0x4c4   :  { %3260 = shalt.err (!%p3257_p4)
}
 0x4c5   :  { %s3261_s5 = scalar_lea.hbm %s3804_s9, 256 }
 0x4c6   :  { %p3262_p5 = scmp.ne.s32.totalorder %s3804_s9, %s3261_s5  ;;  %p3265_p6 = scmp.lt.u32.totalorder %s3261_s5, %s3804_s9 }
 0x4c8   :  { %p3267_p7 = pnand %p3265_p6, %p3262_p5 }
 0x4ca   :  { %3270 = shalt.err (!%p3267_p7)
}
 0x4cb   :  { %2605 = dma.vmem_to_hbm [thread:$0]  %s2600_s15, 256, %s3804_s9, [#allocation4], %s3283_s21, %s3283_s21, %s3284_s22  }
 0x4cc   :  { %3279 = dma.done.wait [#allocation4], 256  }
 0x4cd   :  { %3280 = vsyncadd [#allocation4], 4294967040 }
 0x4ce   :  { %2609 = vsyncpa [#allocation3], 1 }
 0x4cf   :  { %2610 = vsyncpa [#allocation6], 1 }
 0x4d0   :  { %2611 = vsyncpa [#allocation9], 1 }
 0x4d1   :  { %2612 = vsyncpa [#allocation12], 1 }
 0x4d2   :  { %2613 = vsyncpa [#allocation4], 1 }

</bundles_post_ra>
